<compile_context>
chip_gen: v7x
topology: tpu7x:2x2x1
jax: 0.10.0
libtpu: 0.0.40
codegen_flags: <defaults>
</compile_context>

<pallas_src>
import functools

import jax
import jax.numpy as jnp
from jax.experimental import pallas as pl
from jax.experimental.pallas import tpu as pltpu


def _round_up(x, m):
    return (x + m - 1) // m * m


def _vmem_limit_bytes():
    """Generation-aware scoped-VMEM limit (fallback: assume 64 MiB parts)."""
    cap = 64 * 1024 * 1024
    try:
        info = pltpu.get_tpu_info()
        c = getattr(info, "vmem_capacity_bytes", None)
        if c:
            cap = int(c)
    except Exception:
        pass
    return max(32 * 1024 * 1024, min(int(cap * 0.6), 112 * 1024 * 1024))


def _choose_lane_tile(C, n_lanes, vmem_budget, cap, slabs):
    """Largest x128 lane tile such that ~`slabs` live (C, tile) f32 slabs
    (double-buffered in/out blocks + temporaries) fit inside half the budget."""
    per_lane = slabs * C * 4
    t = (vmem_budget // (2 * per_lane)) // 128 * 128
    t = max(128, min(cap, t))
    return int(min(t, _round_up(n_lanes, 128)))


# ---------------------------------------------------------------------------
# Kernel 1: freq_preprocess 1x1 conv on the native (B, C, H*W) layout.
#   x_ref : (1, C, T)    w_ref : (C, C)    b_ref : (C, 1)    o_ref : (1, C, T)
# ---------------------------------------------------------------------------
def _preconv_kernel(x_ref, w_ref, b_ref, o_ref):
    o_ref[0] = (jnp.dot(w_ref[...], x_ref[0],
                        preferred_element_type=jnp.float32) + b_ref[...])


# ---------------------------------------------------------------------------
# Kernel 2: frequency-domain processing, two-pass softmax over Pf chunks.
#   grid = (B, phase, chunk).  phase 0: online softmax stats (running max and
#   rescaled exp-sum in VMEM scratch).  phase 1: recompute the cheap conv
#   blocks and write real / imag / fr_out / ymap_out (all outputs and the
#   mag / y_map inputs are only streamed during phase 1 via `j * p` index
#   maps, so phase 0 moves only the pha / fr chunks).
# ---------------------------------------------------------------------------
def _make_freq_kernel(C, Pf, tile):
    masked = (Pf % tile) != 0          # only the last chunk holds padded lanes

    def kernel(mag_ref, pha_ref, fr_ref, ym_ref,
               w1_ref, b1_ref, w2_ref, b2_ref,
               real_ref, imag_ref, fro_ref, ymo_ref,
               m_scr, l_scr):
        p = pl.program_id(1)           # 0: stats pass, 1: output pass
        j = pl.program_id(2)           # Pf chunk index

        def conv_block(v, i):          # Conv1x1 -> LeakyReLU(0.1) -> Conv1x1
            h = (jnp.dot(w1_ref[i], v, preferred_element_type=jnp.float32)
                 + b1_ref[i])
            h = jnp.maximum(h, 0.1 * h)
            return (jnp.dot(w2_ref[i], h, preferred_element_type=jnp.float32)
                    + b2_ref[i])

        def chan_normalize(t):         # F.normalize over channels (sublanes)
            ss = jnp.sum(t * t, axis=0, keepdims=True)
            return t * jax.lax.rsqrt(jnp.maximum(ss, 1e-24))

        # pha / fr paths are needed in both phases; recomputing them in
        # phase 1 is cheaper than spilling the intermediates to HBM.
        pha_o = conv_block(pha_ref[0], 1)                    # process_pha
        fr_o = conv_block(fr_ref[0], 2)                      # process_fr
        vis = chan_normalize(pha_o)
        fra = chan_normalize(fr_o)
        mult = vis * fra
        if masked:
            lane = jax.lax.broadcasted_iota(jnp.int32, (C, tile), 1)
            mult = jnp.where(lane + j * tile < Pf, mult, -1e30)

        @pl.when(jnp.logical_and(p == 0, j == 0))
        def _():
            m_scr[...] = jnp.full_like(m_scr, -1e30)
            l_scr[...] = jnp.zeros_like(l_scr)

        @pl.when(p == 0)               # online max / rescaled exp-sum
        def _():
            m_prev = m_scr[...]
            m_new = jnp.maximum(m_prev, jnp.max(mult, axis=1, keepdims=True))
            l_scr[...] = (l_scr[...] * jnp.exp(m_prev - m_new)
                          + jnp.sum(jnp.exp(mult - m_new), axis=1,
                                    keepdims=True))
            m_scr[...] = m_new

        @pl.when(p == 1)               # finalize & write all four outputs
        def _():
            mag_o = conv_block(mag_ref[0], 0)                # process_amp
            ym_o = jax.nn.sigmoid(conv_block(ym_ref[0], 3))  # process_map
            sm = jnp.exp(mult - m_scr[...]) / l_scr[...]     # exact divide
            pha_map = vis * sm + vis
            magc = mag_o * ym_o + mag_o
            real_ref[0] = magc * jnp.cos(pha_map)
            imag_ref[0] = magc * jnp.sin(pha_map)
            fro_ref[0] = fr_o
            ymo_ref[0] = ym_o

    return kernel


# ---------------------------------------------------------------------------
# Wrapper
# ---------------------------------------------------------------------------
def fft_process(x, fr, y_map, params, *, pre_tile=None, freq_tile=None):
    B, C, H, W = x.shape
    Wf = W // 2 + 1
    P = H * W
    Pf = H * Wf

    vmem_limit = _vmem_limit_bytes()

    # --- Stage 1: freq_preprocess conv, native layout, large lane tiles ---
    if pre_tile is None:
        pre_tile = _choose_lane_tile(C, P, vmem_limit, cap=32768, slabs=8)
    Pp = _round_up(P, pre_tile)
    x_flat = x.reshape(B, C, P)
    if Pp != P:
        x_flat = jnp.pad(x_flat, ((0, 0), (0, 0), (0, Pp - P)))

    pre = pl.pallas_call(
        _preconv_kernel,
        out_shape=jax.ShapeDtypeStruct((B, C, Pp), jnp.float32),
        grid=(B, Pp // pre_tile),
        in_specs=[pl.BlockSpec((1, C, pre_tile), lambda b, i: (b, 0, i)),
                  pl.BlockSpec((C, C), lambda b, i: (0, 0)),
                  pl.BlockSpec((C, 1), lambda b, i: (0, 0))],
        out_specs=pl.BlockSpec((1, C, pre_tile), lambda b, i: (b, 0, i)),
        compiler_params=pltpu.CompilerParams(
            dimension_semantics=("parallel", "parallel"),
            vmem_limit_bytes=vmem_limit),
    )(x_flat, params["pre_w"], params["pre_b"])

    if Pp != P:
        pre = pre[:, :, :P]
    pre = pre.reshape(B, C, H, W)

    # --- FFT glue (complex dtypes have no Pallas TPU representation) ---
    # TODO(synk): rfft2 / irfft2 remain XLA ops; no Pallas complex support.
    xf = jnp.fft.rfft2(pre, norm="backward")                 # (B, C, H, Wf)
    mag = jnp.abs(xf).reshape(B, C, Pf)
    pha = jnp.angle(xf).reshape(B, C, Pf)
    fr_f = fr.reshape(B, C, Pf)
    ym_f = y_map.reshape(B, C, Pf)

    # --- Stage 2: fused frequency-domain processing, Pf-chunked two-pass ---
    if freq_tile is None:
        freq_tile = _choose_lane_tile(C, Pf, vmem_limit, cap=8192, slabs=28)
    Pfp = _round_up(Pf, freq_tile)
    if Pfp != Pf:
        padw = ((0, 0), (0, 0), (0, Pfp - Pf))
        mag, pha = jnp.pad(mag, padw), jnp.pad(pha, padw)
        fr_f, ym_f = jnp.pad(fr_f, padw), jnp.pad(ym_f, padw)
    nj = Pfp // freq_tile

    chunk = pl.BlockSpec((1, C, freq_tile), lambda b, p, j: (b, 0, j))
    # mag / y_map inputs and all outputs are only touched during phase 1;
    # during phase 0 their index map collapses to chunk 0 (stays resident,
    # no extra HBM traffic).
    chunk_p1 = pl.BlockSpec((1, C, freq_tile), lambda b, p, j: (b, 0, j * p))
    wspec = pl.BlockSpec((4, C, C), lambda b, p, j: (0, 0, 0))
    bspec = pl.BlockSpec((4, C, 1), lambda b, p, j: (0, 0, 0))

    real, imag, fr_o, ym_o = pl.pallas_call(
        _make_freq_kernel(C, Pf, freq_tile),
        out_shape=[jax.ShapeDtypeStruct((B, C, Pfp), jnp.float32)] * 4,
        grid=(B, 2, nj),
        in_specs=[chunk_p1, chunk, chunk, chunk_p1, wspec, bspec, wspec, bspec],
        out_specs=[chunk_p1] * 4,
        scratch_shapes=[pltpu.VMEM((C, 1), jnp.float32),   # running max
                        pltpu.VMEM((C, 1), jnp.float32)],  # running exp-sum
        compiler_params=pltpu.CompilerParams(
            dimension_semantics=("parallel", "arbitrary", "arbitrary"),
            vmem_limit_bytes=vmem_limit),
    )(mag, pha, fr_f, ym_f,
      params["W1"], params["B1"], params["W2"], params["B2"])

    if Pfp != Pf:
        real, imag = real[:, :, :Pf], imag[:, :, :Pf]
        fr_o, ym_o = fr_o[:, :, :Pf], ym_o[:, :, :Pf]
    real = real.reshape(B, C, H, Wf)
    imag = imag.reshape(B, C, H, Wf)
    fr_o = fr_o.reshape(B, C, H, Wf)
    ym_o = ym_o.reshape(B, C, H, Wf)

    x_out = jnp.fft.irfft2(jax.lax.complex(real, imag), s=(H, W),
                           norm="backward")
    return x_out + x, fr_o, ym_o


# ---------------------------------------------------------------------------
# Pure-JAX reference (mirrors the PyTorch forward) for verification.
# ---------------------------------------------------------------------------
def fft_process_ref(x, fr, y_map, params):
    B, C, H, W = x.shape

    def conv1x1(t, w, b):
        return jnp.einsum("oi,bihw->bohw", w, t) + b.reshape(1, -1, 1, 1)

    def block(t, i):
        h = conv1x1(t, params["W1"][i], params["B1"][i])
        h = jnp.where(h > 0, h, 0.1 * h)
        return conv1x1(h, params["W2"][i], params["B2"][i])

    pre = conv1x1(x, params["pre_w"], params["pre_b"])
    xf = jnp.fft.rfft2(pre, norm="backward")
    mag = block(jnp.abs(xf), 0)
    pha = block(jnp.angle(xf), 1)
    fr2 = block(fr, 2)
    ymap2 = jax.nn.sigmoid(block(y_map, 3))

    def chan_norm(t):
        return t / jnp.maximum(
            jnp.sqrt(jnp.sum(t * t, axis=1, keepdims=True)), 1e-12)

    vis = chan_norm(pha)
    fra = chan_norm(fr2)
    mult = (vis * fra).reshape(B, C, -1)
    sm = jax.nn.softmax(mult, axis=2).reshape(vis.shape)
    pha_map = vis * sm + vis
    mag = mag * ymap2 + mag
    xo = jnp.fft.irfft2(mag * jnp.cos(pha_map) + 1j * mag * jnp.sin(pha_map),
                        s=(H, W), norm="backward")
    return xo + x, fr2, ymap2


# ---------------------------------------------------------------------------
def init_params(nf, key):
    ks = jax.random.split(key, 6)
    s = 0.1
    return {
        "pre_w": s * jax.random.normal(ks[0], (nf, nf), jnp.float32),
        "pre_b": s * jax.random.normal(ks[1], (nf, 1), jnp.float32),
        # stacked [process_amp, process_pha, process_fr, process_map]
        "W1": s * jax.random.normal(ks[2], (4, nf, nf), jnp.float32),
        "B1": s * jax.random.normal(ks[3], (4, nf, 1), jnp.float32),
        "W2": s * jax.random.normal(ks[4], (4, nf, nf), jnp.float32),
        "B2": s * jax.random.normal(ks[5], (4, nf, 1), jnp.float32),
    }


if __name__ == "__main__":
    B, nf, H, W = 2, 8, 16, 16
    Wf = W // 2 + 1

    key = jax.random.PRNGKey(0)
    kx, kf, ky, kp = jax.random.split(key, 4)
    x = jax.random.normal(kx, (B, nf, H, W), jnp.float32)
    # fr and y_map live in the rfft2 half-spectrum domain (B, nf, H, W//2+1).
    fr = jax.random.normal(kf, (B, nf, H, Wf), jnp.float32)
    y_map = jax.random.normal(ky, (B, nf, H, Wf), jnp.float32)

    params = init_params(nf, kp)

    # freq_tile=128 forces 2 Pf chunks at this demo size so the two-pass
    # softmax / chunk-carry path is exercised end-to-end.
    run = jax.jit(functools.partial(fft_process, freq_tile=128))
    out, fr_out, ymap_out = run(x, fr, y_map, params)
    jax.block_until_ready((out, fr_out, ymap_out))

    ref_out, ref_fr, ref_ymap = fft_process_ref(x, fr, y_map, params)
    jax.block_until_ready((ref_out, ref_fr, ref_ymap))

    assert out.shape == (B, nf, H, W)
    assert fr_out.shape == (B, nf, H, Wf)
    assert ymap_out.shape == (B, nf, H, Wf)
    assert jnp.allclose(out, ref_out, rtol=2e-3, atol=2e-3)
    assert jnp.allclose(fr_out, ref_fr, rtol=2e-3, atol=2e-3)
    assert jnp.allclose(ymap_out, ref_ymap, rtol=2e-3, atol=2e-3)

    print("KERNEL_OK")
</pallas_src>

<mosaic_0001>
module attributes {stable_mosaic.version = 11 : i64} {
  func.func @_preconv_kernel(%arg0: i32, %arg1: i32, %arg2: memref<1x8x256xf32, #tpu.memory_space<vmem>>, %arg3: memref<8x8xf32, #tpu.memory_space<vmem>>, %arg4: memref<8x1xf32, #tpu.memory_space<vmem>>, %arg5: memref<1x8x256xf32, #tpu.memory_space<vmem>>) attributes {dimension_semantics = [#tpu.dimension_semantics<parallel>, #tpu.dimension_semantics<parallel>], iteration_bounds = array<i64: 2, 1>, scalar_prefetch = 0 : i64, scratch_operands = 0 : i64, tpu.core_type = #tpu.core_type<tc>, window_params = [{transform_indices = @transform_0, window_bounds = array<i64: 1, 8, 256>}, {pipeline_mode = #tpu.pipeline_mode<synchronous>, transform_indices = @transform_1, window_bounds = array<i64: 8, 8>}, {pipeline_mode = #tpu.pipeline_mode<synchronous>, transform_indices = @transform_2, window_bounds = array<i64: 8, 1>}, {transform_indices = @transform_3, window_bounds = array<i64: 1, 8, 256>}]} {
    %c0 = arith.constant 0 : index
    %c0_0 = arith.constant 0 : index
    %0 = vector.load %arg3[%c0, %c0_0] : memref<8x8xf32, #tpu.memory_space<vmem>>, vector<8x8xf32>
    %c0_1 = arith.constant 0 : index
    %c0_2 = arith.constant 0 : index
    %c0_3 = arith.constant 0 : index
    %1 = vector.load %arg2[%c0_1, %c0_2, %c0_3] : memref<1x8x256xf32, #tpu.memory_space<vmem>>, vector<1x8x256xf32>
    %2 = vector.shape_cast %1 : vector<1x8x256xf32> to vector<8x256xf32>
    %cst = arith.constant dense<0.000000e+00> : vector<8x256xf32>
    %3 = tpu.matmul %0, %2, %cst {dimension_numbers = #tpu.dot_dimension_numbers<[1], [0], [0], [1], [0, 0, 1, 1], [], []>} : vector<8x8xf32>, vector<8x256xf32>, vector<8x256xf32> -> vector<8x256xf32>
    %c0_4 = arith.constant 0 : index
    %c0_5 = arith.constant 0 : index
    %4 = vector.load %arg4[%c0_4, %c0_5] : memref<8x1xf32, #tpu.memory_space<vmem>>, vector<8x1xf32>
    %5 = vector.broadcast %4 : vector<8x1xf32> to vector<8x256xf32>
    %6 = arith.addf %3, %5 : vector<8x256xf32>
    %c0_6 = arith.constant 0 : index
    %c0_7 = arith.constant 0 : index
    %c0_8 = arith.constant 0 : index
    %7 = vector.load %arg5[%c0_6, %c0_7, %c0_8] : memref<1x8x256xf32, #tpu.memory_space<vmem>>, vector<1x8x256xf32>
    %8 = vector.shape_cast %7 : vector<1x8x256xf32> to vector<8x256xf32>
    %9 = vector.shape_cast %6 : vector<8x256xf32> to vector<1x8x256xf32>
    tpu.vector_store %arg5[%c0_6, %c0_7, %c0_8], %9 {strides = array<i32>} : memref<1x8x256xf32, #tpu.memory_space<vmem>>, vector<1x8x256xf32>,
    return
  }
  func.func @transform_0(%arg0: i32, %arg1: i32) -> (i32, i32, i32) {
    %c0_i32 = arith.constant 0 : i32
    %c0_i32_0 = arith.constant 0 : i32
    return %arg0, %c0_i32, %arg1 : i32, i32, i32
  }
  func.func @transform_1(%arg0: i32, %arg1: i32) -> (i32, i32) {
    %c0_i32 = arith.constant 0 : i32
    %c0_i32_0 = arith.constant 0 : i32
    %c0_i32_1 = arith.constant 0 : i32
    return %c0_i32, %c0_i32_0 : i32, i32
  }
  func.func @transform_2(%arg0: i32, %arg1: i32) -> (i32, i32) {
    %c0_i32 = arith.constant 0 : i32
    %c0_i32_0 = arith.constant 0 : i32
    %c0_i32_1 = arith.constant 0 : i32
    return %c0_i32, %c0_i32_0 : i32, i32
  }
  func.func @transform_3(%arg0: i32, %arg1: i32) -> (i32, i32, i32) {
    %c0_i32 = arith.constant 0 : i32
    %c0_i32_0 = arith.constant 0 : i32
    return %arg0, %c0_i32, %arg1 : i32, i32, i32
  }
}

module attributes {stable_mosaic.version = 11 : i64} {
  func.func @kernel(%arg0: i32, %arg1: i32, %arg2: i32, %arg3: memref<1x8x128xf32, #tpu.memory_space<vmem>>, %arg4: memref<1x8x128xf32, #tpu.memory_space<vmem>>, %arg5: memref<1x8x128xf32, #tpu.memory_space<vmem>>, %arg6: memref<1x8x128xf32, #tpu.memory_space<vmem>>, %arg7: memref<4x8x8xf32, #tpu.memory_space<vmem>>, %arg8: memref<4x8x1xf32, #tpu.memory_space<vmem>>, %arg9: memref<4x8x8xf32, #tpu.memory_space<vmem>>, %arg10: memref<4x8x1xf32, #tpu.memory_space<vmem>>, %arg11: memref<1x8x128xf32, #tpu.memory_space<vmem>>, %arg12: memref<1x8x128xf32, #tpu.memory_space<vmem>>, %arg13: memref<1x8x128xf32, #tpu.memory_space<vmem>>, %arg14: memref<1x8x128xf32, #tpu.memory_space<vmem>>, %arg15: memref<8x1xf32, #tpu.memory_space<vmem>>, %arg16: memref<8x1xf32, #tpu.memory_space<vmem>>) attributes {dimension_semantics = [#tpu.dimension_semantics<parallel>, #tpu.dimension_semantics<arbitrary>, #tpu.dimension_semantics<arbitrary>], iteration_bounds = array<i64: 2, 2, 2>, scalar_prefetch = 0 : i64, scratch_operands = 2 : i64, tpu.core_type = #tpu.core_type<tc>, window_params = [{transform_indices = @transform_0, window_bounds = array<i64: 1, 8, 128>}, {transform_indices = @transform_1, window_bounds = array<i64: 1, 8, 128>}, {transform_indices = @transform_2, window_bounds = array<i64: 1, 8, 128>}, {transform_indices = @transform_3, window_bounds = array<i64: 1, 8, 128>}, {pipeline_mode = #tpu.pipeline_mode<synchronous>, transform_indices = @transform_4, window_bounds = array<i64: 4, 8, 8>}, {pipeline_mode = #tpu.pipeline_mode<synchronous>, transform_indices = @transform_5, window_bounds = array<i64: 4, 8, 1>}, {pipeline_mode = #tpu.pipeline_mode<synchronous>, transform_indices = @transform_6, window_bounds = array<i64: 4, 8, 8>}, {pipeline_mode = #tpu.pipeline_mode<synchronous>, transform_indices = @transform_7, window_bounds = array<i64: 4, 8, 1>}, {transform_indices = @transform_8, window_bounds = array<i64: 1, 8, 128>}, {transform_indices = @transform_9, window_bounds = array<i64: 1, 8, 128>}, {transform_indices = @transform_10, window_bounds = array<i64: 1, 8, 128>}, {transform_indices = @transform_11, window_bounds = array<i64: 1, 8, 128>}]} {
    %c0 = arith.constant 0 : index
    %c0_0 = arith.constant 0 : index
    %c0_1 = arith.constant 0 : index
    %0 = vector.load %arg4[%c0, %c0_0, %c0_1] : memref<1x8x128xf32, #tpu.memory_space<vmem>>, vector<1x8x128xf32>
    %1 = vector.shape_cast %0 : vector<1x8x128xf32> to vector<8x128xf32>
    %c1 = arith.constant 1 : index
    %c0_2 = arith.constant 0 : index
    %c0_3 = arith.constant 0 : index
    %2 = vector.load %arg7[%c1, %c0_2, %c0_3] : memref<4x8x8xf32, #tpu.memory_space<vmem>>, vector<1x8x8xf32>
    %3 = vector.shape_cast %2 : vector<1x8x8xf32> to vector<8x8xf32>
    %cst = arith.constant dense<0.000000e+00> : vector<8x128xf32>
    %4 = tpu.matmul %3, %1, %cst {dimension_numbers = #tpu.dot_dimension_numbers<[1], [0], [0], [1], [0, 0, 1, 1], [], []>} : vector<8x8xf32>, vector<8x128xf32>, vector<8x128xf32> -> vector<8x128xf32>
    %c1_4 = arith.constant 1 : index
    %c0_5 = arith.constant 0 : index
    %c0_6 = arith.constant 0 : index
    %5 = vector.load %arg8[%c1_4, %c0_5, %c0_6] : memref<4x8x1xf32, #tpu.memory_space<vmem>>, vector<1x8x1xf32>
    %6 = vector.shape_cast %5 : vector<1x8x1xf32> to vector<8x1xf32>
    %7 = vector.broadcast %6 : vector<8x1xf32> to vector<8x128xf32>
    %8 = arith.addf %4, %7 : vector<8x128xf32>
    %cst_7 = arith.constant 1.000000e-01 : f32
    %9 = vector.broadcast %cst_7 : f32 to vector<8x128xf32>
    %10 = arith.mulf %9, %8 : vector<8x128xf32>
    %11 = arith.maximumf %8, %10 : vector<8x128xf32>
    %c1_8 = arith.constant 1 : index
    %c0_9 = arith.constant 0 : index
    %c0_10 = arith.constant 0 : index
    %12 = vector.load %arg9[%c1_8, %c0_9, %c0_10] : memref<4x8x8xf32, #tpu.memory_space<vmem>>, vector<1x8x8xf32>
    %13 = vector.shape_cast %12 : vector<1x8x8xf32> to vector<8x8xf32>
    %cst_11 = arith.constant dense<0.000000e+00> : vector<8x128xf32>
    %14 = tpu.matmul %13, %11, %cst_11 {dimension_numbers = #tpu.dot_dimension_numbers<[1], [0], [0], [1], [0, 0, 1, 1], [], []>} : vector<8x8xf32>, vector<8x128xf32>, vector<8x128xf32> -> vector<8x128xf32>
    %c1_12 = arith.constant 1 : index
    %c0_13 = arith.constant 0 : index
    %c0_14 = arith.constant 0 : index
    %15 = vector.load %arg10[%c1_12, %c0_13, %c0_14] : memref<4x8x1xf32, #tpu.memory_space<vmem>>, vector<1x8x1xf32>
    %16 = vector.shape_cast %15 : vector<1x8x1xf32> to vector<8x1xf32>
    %17 = vector.broadcast %16 : vector<8x1xf32> to vector<8x128xf32>
    %18 = arith.addf %14, %17 : vector<8x128xf32>
    %c0_15 = arith.constant 0 : index
    %c0_16 = arith.constant 0 : index
    %c0_17 = arith.constant 0 : index
    %19 = vector.load %arg5[%c0_15, %c0_16, %c0_17] : memref<1x8x128xf32, #tpu.memory_space<vmem>>, vector<1x8x128xf32>
    %20 = vector.shape_cast %19 : vector<1x8x128xf32> to vector<8x128xf32>
    %c2 = arith.constant 2 : index
    %c0_18 = arith.constant 0 : index
    %c0_19 = arith.constant 0 : index
    %21 = vector.load %arg7[%c2, %c0_18, %c0_19] : memref<4x8x8xf32, #tpu.memory_space<vmem>>, vector<1x8x8xf32>
    %22 = vector.shape_cast %21 : vector<1x8x8xf32> to vector<8x8xf32>
    %cst_20 = arith.constant dense<0.000000e+00> : vector<8x128xf32>
    %23 = tpu.matmul %22, %20, %cst_20 {dimension_numbers = #tpu.dot_dimension_numbers<[1], [0], [0], [1], [0, 0, 1, 1], [], []>} : vector<8x8xf32>, vector<8x128xf32>, vector<8x128xf32> -> vector<8x128xf32>
    %c2_21 = arith.constant 2 : index
    %c0_22 = arith.constant 0 : index
    %c0_23 = arith.constant 0 : index
    %24 = vector.load %arg8[%c2_21, %c0_22, %c0_23] : memref<4x8x1xf32, #tpu.memory_space<vmem>>, vector<1x8x1xf32>
    %25 = vector.shape_cast %24 : vector<1x8x1xf32> to vector<8x1xf32>
    %26 = vector.broadcast %25 : vector<8x1xf32> to vector<8x128xf32>
    %27 = arith.addf %23, %26 : vector<8x128xf32>
    %cst_24 = arith.constant 1.000000e-01 : f32
    %28 = vector.broadcast %cst_24 : f32 to vector<8x128xf32>
    %29 = arith.mulf %28, %27 : vector<8x128xf32>
    %30 = arith.maximumf %27, %29 : vector<8x128xf32>
    %c2_25 = arith.constant 2 : index
    %c0_26 = arith.constant 0 : index
    %c0_27 = arith.constant 0 : index
    %31 = vector.load %arg9[%c2_25, %c0_26, %c0_27] : memref<4x8x8xf32, #tpu.memory_space<vmem>>, vector<1x8x8xf32>
    %32 = vector.shape_cast %31 : vector<1x8x8xf32> to vector<8x8xf32>
    %cst_28 = arith.constant dense<0.000000e+00> : vector<8x128xf32>
    %33 = tpu.matmul %32, %30, %cst_28 {dimension_numbers = #tpu.dot_dimension_numbers<[1], [0], [0], [1], [0, 0, 1, 1], [], []>} : vector<8x8xf32>, vector<8x128xf32>, vector<8x128xf32> -> vector<8x128xf32>
    %c2_29 = arith.constant 2 : index
    %c0_30 = arith.constant 0 : index
    %c0_31 = arith.constant 0 : index
    %34 = vector.load %arg10[%c2_29, %c0_30, %c0_31] : memref<4x8x1xf32, #tpu.memory_space<vmem>>, vector<1x8x1xf32>
    %35 = vector.shape_cast %34 : vector<1x8x1xf32> to vector<8x1xf32>
    %36 = vector.broadcast %35 : vector<8x1xf32> to vector<8x128xf32>
    %37 = arith.addf %33, %36 : vector<8x128xf32>
    %38 = arith.mulf %18, %18 : vector<8x128xf32>
    %cst_32 = arith.constant dense<0.000000e+00> : vector<128xf32>
    %39 = vector.multi_reduction <add>, %38, %cst_32 [0] : vector<8x128xf32> to vector<128xf32>
    %40 = vector.shape_cast %39 : vector<128xf32> to vector<1x128xf32>
    %cst_33 = arith.constant 1.000000e-24 : f32
    %41 = vector.broadcast %cst_33 : f32 to vector<1x128xf32>
    %42 = arith.maximumf %40, %41 : vector<1x128xf32>
    %43 = math.rsqrt %42 : vector<1x128xf32>
    %44 = vector.broadcast %43 : vector<1x128xf32> to vector<8x128xf32>
    %45 = arith.mulf %18, %44 : vector<8x128xf32>
    %46 = arith.mulf %37, %37 : vector<8x128xf32>
    %cst_34 = arith.constant dense<0.000000e+00> : vector<128xf32>
    %47 = vector.multi_reduction <add>, %46, %cst_34 [0] : vector<8x128xf32> to vector<128xf32>
    %48 = vector.shape_cast %47 : vector<128xf32> to vector<1x128xf32>
    %cst_35 = arith.constant 1.000000e-24 : f32
    %49 = vector.broadcast %cst_35 : f32 to vector<1x128xf32>
    %50 = arith.maximumf %48, %49 : vector<1x128xf32>
    %51 = math.rsqrt %50 : vector<1x128xf32>
    %52 = vector.broadcast %51 : vector<1x128xf32> to vector<8x128xf32>
    %53 = arith.mulf %37, %52 : vector<8x128xf32>
    %54 = arith.mulf %45, %53 : vector<8x128xf32>
    %55 = tpu.iota {dimensions = array<i32: 1>} : vector<8x128xi32>
    %c128_i32 = arith.constant 128 : i32
    %56 = arith.muli %arg2, %c128_i32 : i32
    %57 = vector.broadcast %56 : i32 to vector<8x128xi32>
    %58 = arith.addi %55, %57 : vector<8x128xi32>
    %c144_i32 = arith.constant 144 : i32
    %59 = vector.broadcast %c144_i32 : i32 to vector<8x128xi32>
    %60 = arith.cmpi slt, %58, %59 : vector<8x128xi32>
    %cst_36 = arith.constant -1.000000e+30 : f32
    %61 = vector.broadcast %cst_36 : f32 to vector<8x128xf32>
    %62 = arith.select %60, %54, %61 : vector<8x128xi1>, vector<8x128xf32>
    %c0_i32 = arith.constant 0 : i32
    %63 = arith.cmpi eq, %arg1, %c0_i32 : i32
    %c0_i32_37 = arith.constant 0 : i32
    %64 = arith.cmpi eq, %arg2, %c0_i32_37 : i32
    %65 = arith.andi %63, %64 : i1
    %66 = arith.extui %65 : i1 to i32
    %c0_i32_38 = arith.constant 0 : i32
    %67 = arith.cmpi ne, %66, %c0_i32_38 : i32
    scf.if %67 {
      %cst_42 = arith.constant -1.000000e+30 : f32
      %74 = vector.broadcast %cst_42 : f32 to vector<8x1xf32>
      %c0_43 = arith.constant 0 : index
      %c0_44 = arith.constant 0 : index
      %75 = vector.load %arg15[%c0_43, %c0_44] : memref<8x1xf32, #tpu.memory_space<vmem>>, vector<8x1xf32>
      tpu.vector_store %arg15[%c0_43, %c0_44], %74 {strides = array<i32>} : memref<8x1xf32, #tpu.memory_space<vmem>>, vector<8x1xf32>,
      %cst_45 = arith.constant 0.000000e+00 : f32
      %76 = vector.broadcast %cst_45 : f32 to vector<8x1xf32>
      %c0_46 = arith.constant 0 : index
      %c0_47 = arith.constant 0 : index
      %77 = vector.load %arg16[%c0_46, %c0_47] : memref<8x1xf32, #tpu.memory_space<vmem>>, vector<8x1xf32>
      tpu.vector_store %arg16[%c0_46, %c0_47], %76 {strides = array<i32>} : memref<8x1xf32, #tpu.memory_space<vmem>>, vector<8x1xf32>,
    } else {
    }
    %c0_i32_39 = arith.constant 0 : i32
    %68 = arith.cmpi eq, %arg1, %c0_i32_39 : i32
    %69 = arith.extui %68 : i1 to i32
    %c0_i32_40 = arith.constant 0 : i32
    %70 = arith.cmpi ne, %69, %c0_i32_40 : i32
    scf.if %70 {
      %c0_42 = arith.constant 0 : index
      %c0_43 = arith.constant 0 : index
      %74 = vector.load %arg15[%c0_42, %c0_43] : memref<8x1xf32, #tpu.memory_space<vmem>>, vector<8x1xf32>
      %cst_44 = arith.constant dense<0xFF800000> : vector<8xf32>
      %75 = vector.multi_reduction <maximumf>, %62, %cst_44 [1] : vector<8x128xf32> to vector<8xf32>
      %76 = vector.shape_cast %75 : vector<8xf32> to vector<8x1xf32>
      %77 = arith.maximumf %74, %76 : vector<8x1xf32>
      %c0_45 = arith.constant 0 : index
      %c0_46 = arith.constant 0 : index
      %78 = vector.load %arg16[%c0_45, %c0_46] : memref<8x1xf32, #tpu.memory_space<vmem>>, vector<8x1xf32>
      %79 = arith.subf %74, %77 : vector<8x1xf32>
      %80 = math.exp %79 : vector<8x1xf32>
      %81 = arith.mulf %78, %80 : vector<8x1xf32>
      %82 = vector.broadcast %77 : vector<8x1xf32> to vector<8x128xf32>
      %83 = arith.subf %62, %82 : vector<8x128xf32>
      %84 = math.exp %83 : vector<8x128xf32>
      %cst_47 = arith.constant dense<0.000000e+00> : vector<8xf32>
      %85 = vector.multi_reduction <add>, %84, %cst_47 [1] : vector<8x128xf32> to vector<8xf32>
      %86 = vector.shape_cast %85 : vector<8xf32> to vector<8x1xf32>
      %87 = arith.addf %81, %86 : vector<8x1xf32>
      %c0_48 = arith.constant 0 : index
      %c0_49 = arith.constant 0 : index
      %88 = vector.load %arg16[%c0_48, %c0_49] : memref<8x1xf32, #tpu.memory_space<vmem>>, vector<8x1xf32>
      tpu.vector_store %arg16[%c0_48, %c0_49], %87 {strides = array<i32>} : memref<8x1xf32, #tpu.memory_space<vmem>>, vector<8x1xf32>,
      %c0_50 = arith.constant 0 : index
      %c0_51 = arith.constant 0 : index
      %89 = vector.load %arg15[%c0_50, %c0_51] : memref<8x1xf32, #tpu.memory_space<vmem>>, vector<8x1xf32>
      tpu.vector_store %arg15[%c0_50, %c0_51], %77 {strides = array<i32>} : memref<8x1xf32, #tpu.memory_space<vmem>>, vector<8x1xf32>,
    } else {
    }
    %c1_i32 = arith.constant 1 : i32
    %71 = arith.cmpi eq, %arg1, %c1_i32 : i32
    %72 = arith.extui %71 : i1 to i32
    %c0_i32_41 = arith.constant 0 : i32
    %73 = arith.cmpi ne, %72, %c0_i32_41 : i32
    scf.if %73 {
      %c0_42 = arith.constant 0 : index
      %c0_43 = arith.constant 0 : index
      %c0_44 = arith.constant 0 : index
      %74 = vector.load %arg3[%c0_42, %c0_43, %c0_44] : memref<1x8x128xf32, #tpu.memory_space<vmem>>, vector<1x8x128xf32>
      %75 = vector.shape_cast %74 : vector<1x8x128xf32> to vector<8x128xf32>
      %c0_45 = arith.constant 0 : index
      %c0_46 = arith.constant 0 : index
      %c0_47 = arith.constant 0 : index
      %76 = vector.load %arg7[%c0_45, %c0_46, %c0_47] : memref<4x8x8xf32, #tpu.memory_space<vmem>>, vector<1x8x8xf32>
      %77 = vector.shape_cast %76 : vector<1x8x8xf32> to vector<8x8xf32>
      %cst_48 = arith.constant dense<0.000000e+00> : vector<8x128xf32>
      %78 = tpu.matmul %77, %75, %cst_48 {dimension_numbers = #tpu.dot_dimension_numbers<[1], [0], [0], [1], [0, 0, 1, 1], [], []>} : vector<8x8xf32>, vector<8x128xf32>, vector<8x128xf32> -> vector<8x128xf32>
      %c0_49 = arith.constant 0 : index
      %c0_50 = arith.constant 0 : index
      %c0_51 = arith.constant 0 : index
      %79 = vector.load %arg8[%c0_49, %c0_50, %c0_51] : memref<4x8x1xf32, #tpu.memory_space<vmem>>, vector<1x8x1xf32>
      %80 = vector.shape_cast %79 : vector<1x8x1xf32> to vector<8x1xf32>
      %81 = vector.broadcast %80 : vector<8x1xf32> to vector<8x128xf32>
      %82 = arith.addf %78, %81 : vector<8x128xf32>
      %cst_52 = arith.constant 1.000000e-01 : f32
      %83 = vector.broadcast %cst_52 : f32 to vector<8x128xf32>
      %84 = arith.mulf %83, %82 : vector<8x128xf32>
      %85 = arith.maximumf %82, %84 : vector<8x128xf32>
      %c0_53 = arith.constant 0 : index
      %c0_54 = arith.constant 0 : index
      %c0_55 = arith.constant 0 : index
      %86 = vector.load %arg9[%c0_53, %c0_54, %c0_55] : memref<4x8x8xf32, #tpu.memory_space<vmem>>, vector<1x8x8xf32>
      %87 = vector.shape_cast %86 : vector<1x8x8xf32> to vector<8x8xf32>
      %cst_56 = arith.constant dense<0.000000e+00> : vector<8x128xf32>
      %88 = tpu.matmul %87, %85, %cst_56 {dimension_numbers = #tpu.dot_dimension_numbers<[1], [0], [0], [1], [0, 0, 1, 1], [], []>} : vector<8x8xf32>, vector<8x128xf32>, vector<8x128xf32> -> vector<8x128xf32>
      %c0_57 = arith.constant 0 : index
      %c0_58 = arith.constant 0 : index
      %c0_59 = arith.constant 0 : index
      %89 = vector.load %arg10[%c0_57, %c0_58, %c0_59] : memref<4x8x1xf32, #tpu.memory_space<vmem>>, vector<1x8x1xf32>
      %90 = vector.shape_cast %89 : vector<1x8x1xf32> to vector<8x1xf32>
      %91 = vector.broadcast %90 : vector<8x1xf32> to vector<8x128xf32>
      %92 = arith.addf %88, %91 : vector<8x128xf32>
      %c0_60 = arith.constant 0 : index
      %c0_61 = arith.constant 0 : index
      %c0_62 = arith.constant 0 : index
      %93 = vector.load %arg6[%c0_60, %c0_61, %c0_62] : memref<1x8x128xf32, #tpu.memory_space<vmem>>, vector<1x8x128xf32>
      %94 = vector.shape_cast %93 : vector<1x8x128xf32> to vector<8x128xf32>
      %c3 = arith.constant 3 : index
      %c0_63 = arith.constant 0 : index
      %c0_64 = arith.constant 0 : index
      %95 = vector.load %arg7[%c3, %c0_63, %c0_64] : memref<4x8x8xf32, #tpu.memory_space<vmem>>, vector<1x8x8xf32>
      %96 = vector.shape_cast %95 : vector<1x8x8xf32> to vector<8x8xf32>
      %cst_65 = arith.constant dense<0.000000e+00> : vector<8x128xf32>
      %97 = tpu.matmul %96, %94, %cst_65 {dimension_numbers = #tpu.dot_dimension_numbers<[1], [0], [0], [1], [0, 0, 1, 1], [], []>} : vector<8x8xf32>, vector<8x128xf32>, vector<8x128xf32> -> vector<8x128xf32>
      %c3_66 = arith.constant 3 : index
      %c0_67 = arith.constant 0 : index
      %c0_68 = arith.constant 0 : index
      %98 = vector.load %arg8[%c3_66, %c0_67, %c0_68] : memref<4x8x1xf32, #tpu.memory_space<vmem>>, vector<1x8x1xf32>
      %99 = vector.shape_cast %98 : vector<1x8x1xf32> to vector<8x1xf32>
      %100 = vector.broadcast %99 : vector<8x1xf32> to vector<8x128xf32>
      %101 = arith.addf %97, %100 : vector<8x128xf32>
      %cst_69 = arith.constant 1.000000e-01 : f32
      %102 = vector.broadcast %cst_69 : f32 to vector<8x128xf32>
      %103 = arith.mulf %102, %101 : vector<8x128xf32>
      %104 = arith.maximumf %101, %103 : vector<8x128xf32>
      %c3_70 = arith.constant 3 : index
      %c0_71 = arith.constant 0 : index
      %c0_72 = arith.constant 0 : index
      %105 = vector.load %arg9[%c3_70, %c0_71, %c0_72] : memref<4x8x8xf32, #tpu.memory_space<vmem>>, vector<1x8x8xf32>
      %106 = vector.shape_cast %105 : vector<1x8x8xf32> to vector<8x8xf32>
      %cst_73 = arith.constant dense<0.000000e+00> : vector<8x128xf32>
      %107 = tpu.matmul %106, %104, %cst_73 {dimension_numbers = #tpu.dot_dimension_numbers<[1], [0], [0], [1], [0, 0, 1, 1], [], []>} : vector<8x8xf32>, vector<8x128xf32>, vector<8x128xf32> -> vector<8x128xf32>
      %c3_74 = arith.constant 3 : index
      %c0_75 = arith.constant 0 : index
      %c0_76 = arith.constant 0 : index
      %108 = vector.load %arg10[%c3_74, %c0_75, %c0_76] : memref<4x8x1xf32, #tpu.memory_space<vmem>>, vector<1x8x1xf32>
      %109 = vector.shape_cast %108 : vector<1x8x1xf32> to vector<8x1xf32>
      %110 = vector.broadcast %109 : vector<8x1xf32> to vector<8x128xf32>
      %111 = arith.addf %107, %110 : vector<8x128xf32>
      %112 = arith.negf %111 : vector<8x128xf32>
      %113 = math.exp %112 : vector<8x128xf32>
      %cst_77 = arith.constant 1.000000e+00 : f32
      %114 = vector.broadcast %cst_77 : f32 to vector<8x128xf32>
      %115 = arith.addf %114, %113 : vector<8x128xf32>
      %116 = arith.divf %114, %115 : vector<8x128xf32>
      %c0_78 = arith.constant 0 : index
      %c0_79 = arith.constant 0 : index
      %117 = vector.load %arg15[%c0_78, %c0_79] : memref<8x1xf32, #tpu.memory_space<vmem>>, vector<8x1xf32>
      %118 = vector.broadcast %117 : vector<8x1xf32> to vector<8x128xf32>
      %119 = arith.subf %62, %118 : vector<8x128xf32>
      %120 = math.exp %119 : vector<8x128xf32>
      %c0_80 = arith.constant 0 : index
      %c0_81 = arith.constant 0 : index
      %121 = vector.load %arg16[%c0_80, %c0_81] : memref<8x1xf32, #tpu.memory_space<vmem>>, vector<8x1xf32>
      %122 = vector.broadcast %121 : vector<8x1xf32> to vector<8x128xf32>
      %123 = arith.divf %120, %122 : vector<8x128xf32>
      %124 = arith.mulf %45, %123 : vector<8x128xf32>
      %125 = arith.addf %124, %45 : vector<8x128xf32>
      %126 = arith.mulf %92, %116 : vector<8x128xf32>
      %127 = arith.addf %126, %92 : vector<8x128xf32>
      %128 = math.cos %125 : vector<8x128xf32>
      %129 = arith.mulf %127, %128 : vector<8x128xf32>
      %c0_82 = arith.constant 0 : index
      %c0_83 = arith.constant 0 : index
      %c0_84 = arith.constant 0 : index
      %130 = vector.load %arg11[%c0_82, %c0_83, %c0_84] : memref<1x8x128xf32, #tpu.memory_space<vmem>>, vector<1x8x128xf32>
      %131 = vector.shape_cast %130 : vector<1x8x128xf32> to vector<8x128xf32>
      %132 = vector.shape_cast %129 : vector<8x128xf32> to vector<1x8x128xf32>
      tpu.vector_store %arg11[%c0_82, %c0_83, %c0_84], %132 {strides = array<i32>} : memref<1x8x128xf32, #tpu.memory_space<vmem>>, vector<1x8x128xf32>,
      %133 = math.sin %125 : vector<8x128xf32>
      %134 = arith.mulf %127, %133 : vector<8x128xf32>
      %c0_85 = arith.constant 0 : index
      %c0_86 = arith.constant 0 : index
      %c0_87 = arith.constant 0 : index
      %135 = vector.load %arg12[%c0_85, %c0_86, %c0_87] : memref<1x8x128xf32, #tpu.memory_space<vmem>>, vector<1x8x128xf32>
      %136 = vector.shape_cast %135 : vector<1x8x128xf32> to vector<8x128xf32>
      %137 = vector.shape_cast %134 : vector<8x128xf32> to vector<1x8x128xf32>
      tpu.vector_store %arg12[%c0_85, %c0_86, %c0_87], %137 {strides = array<i32>} : memref<1x8x128xf32, #tpu.memory_space<vmem>>, vector<1x8x128xf32>,
      %c0_88 = arith.constant 0 : index
      %c0_89 = arith.constant 0 : index
      %c0_90 = arith.constant 0 : index
      %138 = vector.load %arg13[%c0_88, %c0_89, %c0_90] : memref<1x8x128xf32, #tpu.memory_space<vmem>>, vector<1x8x128xf32>
      %139 = vector.shape_cast %138 : vector<1x8x128xf32> to vector<8x128xf32>
      %140 = vector.shape_cast %37 : vector<8x128xf32> to vector<1x8x128xf32>
      tpu.vector_store %arg13[%c0_88, %c0_89, %c0_90], %140 {strides = array<i32>} : memref<1x8x128xf32, #tpu.memory_space<vmem>>, vector<1x8x128xf32>,
      %c0_91 = arith.constant 0 : index
      %c0_92 = arith.constant 0 : index
      %c0_93 = arith.constant 0 : index
      %141 = vector.load %arg14[%c0_91, %c0_92, %c0_93] : memref<1x8x128xf32, #tpu.memory_space<vmem>>, vector<1x8x128xf32>
      %142 = vector.shape_cast %141 : vector<1x8x128xf32> to vector<8x128xf32>
      %143 = vector.shape_cast %116 : vector<8x128xf32> to vector<1x8x128xf32>
      tpu.vector_store %arg14[%c0_91, %c0_92, %c0_93], %143 {strides = array<i32>} : memref<1x8x128xf32, #tpu.memory_space<vmem>>, vector<1x8x128xf32>,
    } else {
    }
    return
  }
  func.func @transform_0(%arg0: i32, %arg1: i32, %arg2: i32) -> (i32, i32, i32) {
    %0 = arith.muli %arg2, %arg1 : i32
    %c0_i32 = arith.constant 0 : i32
    %c0_i32_0 = arith.constant 0 : i32
    return %arg0, %c0_i32, %0 : i32, i32, i32
  }
  func.func @transform_1(%arg0: i32, %arg1: i32, %arg2: i32) -> (i32, i32, i32) {
    %c0_i32 = arith.constant 0 : i32
    %c0_i32_0 = arith.constant 0 : i32
    return %arg0, %c0_i32, %arg2 : i32, i32, i32
  }
  func.func @transform_2(%arg0: i32, %arg1: i32, %arg2: i32) -> (i32, i32, i32) {
    %c0_i32 = arith.constant 0 : i32
    %c0_i32_0 = arith.constant 0 : i32
    return %arg0, %c0_i32, %arg2 : i32, i32, i32
  }
  func.func @transform_3(%arg0: i32, %arg1: i32, %arg2: i32) -> (i32, i32, i32) {
    %0 = arith.muli %arg2, %arg1 : i32
    %c0_i32 = arith.constant 0 : i32
    %c0_i32_0 = arith.constant 0 : i32
    return %arg0, %c0_i32, %0 : i32, i32, i32
  }
  func.func @transform_4(%arg0: i32, %arg1: i32, %arg2: i32) -> (i32, i32, i32) {
    %c0_i32 = arith.constant 0 : i32
    %c0_i32_0 = arith.constant 0 : i32
    %c0_i32_1 = arith.constant 0 : i32
    %c0_i32_2 = arith.constant 0 : i32
    return %c0_i32, %c0_i32_0, %c0_i32_1 : i32, i32, i32
  }
  func.func @transform_5(%arg0: i32, %arg1: i32, %arg2: i32) -> (i32, i32, i32) {
    %c0_i32 = arith.constant 0 : i32
    %c0_i32_0 = arith.constant 0 : i32
    %c0_i32_1 = arith.constant 0 : i32
    %c0_i32_2 = arith.constant 0 : i32
    return %c0_i32, %c0_i32_0, %c0_i32_1 : i32, i32, i32
  }
  func.func @transform_6(%arg0: i32, %arg1: i32, %arg2: i32) -> (i32, i32, i32) {
    %c0_i32 = arith.constant 0 : i32
    %c0_i32_0 = arith.constant 0 : i32
    %c0_i32_1 = arith.constant 0 : i32
    %c0_i32_2 = arith.constant 0 : i32
    return %c0_i32, %c0_i32_0, %c0_i32_1 : i32, i32, i32
  }
  func.func @transform_7(%arg0: i32, %arg1: i32, %arg2: i32) -> (i32, i32, i32) {
    %c0_i32 = arith.constant 0 : i32
    %c0_i32_0 = arith.constant 0 : i32
    %c0_i32_1 = arith.constant 0 : i32
    %c0_i32_2 = arith.constant 0 : i32
    return %c0_i32, %c0_i32_0, %c0_i32_1 : i32, i32, i32
  }
  func.func @transform_8(%arg0: i32, %arg1: i32, %arg2: i32) -> (i32, i32, i32) {
    %0 = arith.muli %arg2, %arg1 : i32
    %c0_i32 = arith.constant 0 : i32
    %c0_i32_0 = arith.constant 0 : i32
    return %arg0, %c0_i32, %0 : i32, i32, i32
  }
  func.func @transform_9(%arg0: i32, %arg1: i32, %arg2: i32) -> (i32, i32, i32) {
    %0 = arith.muli %arg2, %arg1 : i32
    %c0_i32 = arith.constant 0 : i32
    %c0_i32_0 = arith.constant 0 : i32
    return %arg0, %c0_i32, %0 : i32, i32, i32
  }
  func.func @transform_10(%arg0: i32, %arg1: i32, %arg2: i32) -> (i32, i32, i32) {
    %0 = arith.muli %arg2, %arg1 : i32
    %c0_i32 = arith.constant 0 : i32
    %c0_i32_0 = arith.constant 0 : i32
    return %arg0, %c0_i32, %0 : i32, i32, i32
  }
  func.func @transform_11(%arg0: i32, %arg1: i32, %arg2: i32) -> (i32, i32, i32) {
    %0 = arith.muli %arg2, %arg1 : i32
    %c0_i32 = arith.constant 0 : i32
    %c0_i32_0 = arith.constant 0 : i32
    return %arg0, %c0_i32, %0 : i32, i32, i32
  }
}

</mosaic_0001>

<bundles_post_ra>
// kernel: fft_process.2
= control target key start
LH: loop header
LB: loop body
LE: loop exit
PB: predicated region body
PF: predicated region fallthrough
CT: control target
= control target key end

     0   :  { %s470_s12 = smov 0   ;;  %s472_s13 = smov 0   ;;  %s509_s0 = inlined_call_operand.vmem [shape: f32[2,8,256], index: 0, kind: input, shape index: {}]   ;;  %s510_s1 = inlined_call_operand.vmem [shape: f32[8,8], index: 1, kind: input, shape index: {}]   ;;  %s511_s2 = inlined_call_operand.vmem [shape: f32[8,1], index: 2, kind: input, shape index: {}]   ;;  %s512_s3 = inlined_call_operand.vmem [shape: f32[2,8,256], index: 3, kind: output, shape index: {}]  }
   0x1   :  { %s474_s14 = smov 0  }
   0x2 LB: > { %s25_s15 = sadd.s32 1, %s442_s13  ;;  %p387_p0 = scmp.ge.s32.totalorder %s446_s14, 1  ;;  %s446_s14 = sphi %s474_s14, %s13_s14   ;;  %s442_s13 = sphi %s472_s13, %s514_s13   ;;  %s438_s12 = sphi %s470_s12, %s513_s12  }
   0x3   : > { %p27_p1 = scmp.ge.s32.totalorder %s25_s15, 2  ;;  %p158_p2 = scmp.lt.s32.totalorder %s446_s14, 3 }
   0x5   : > { %s516_s15 = smov (%p27_p1, %s25_s15), 0  ;;  %p159_p3 = pnand %p387_p0, %p158_p2 }
   0x6   : > { %p191_p4 = scmp.lt.s32.totalorder (!%p159_p3), %s438_s12, 1  ;;  %v213_v0 = vld [vmem:[%s511_s2] sm:$0xff] (!%p159_p3)  ;;  %v448_v1 = vmov (!%p159_p3), 0.0   ;;  %v449_v2 = vmov (!%p159_p3), 0   ;;  %vm219_vm0 = vcmask (!%p159_p3), 64512  }
   0x7   : > { %162 = sbr.rel (%p159_p3) target bundleno = 236 (0xec), region = 32  ;;  %287 = vmatprep.mubr.f32.mxu0 (!%p159_p3), %v448_v1  ;;  %423 = vset.pattern.permute.xlu0 (!%p159_p3), %v449_v2  ;;  %v210_v5 = vld [vmem:[%s510_s1] sm:$0xff] (!%p159_p3) }
   0x8   : > { %216 = vperm.xlu0 (!%p159_p3), %423, %v213_v0  }
   0xe   : > { %s518_s12 = smov (!%p191_p4, %s438_s12), 1 }
   0xf   : > { %s395_s18 = sshll.u32 %s518_s12, 4 }
  0x10   : > { %s198_s21 = scalar_lea.vmem %s509_s0, %s395_s18  ;;  %s208_s26 = scalar_lea.vmem %s512_s3, %s395_s18 }
  0x11   : > { %v212_v3 = vld [vmem:[%s198_s21 + $0x8] sm:$0xff]  ;;  %v211_v4 = vld [vmem:[%s198_s21] sm:$0xff] }
  0x12   : > { %223 = vmatprep.subr.mxu0 %v212_v3 }
  0x13   : > { %224 = vmatpush1.msra.mxu0 %v211_v4 }
  0x14   : > { %392 = vmatmul.mubr.msk.f32.vlgmr.msra.gmra.mrb[0].mxu0 %vm219_vm0, %v210_v5 }
  0x87   : > { %v217_v6 = vpop.permute.xlu0 %216 }
  0xe7   : > { %v289_v7 = vpop.f32.mrb[0].mxu0 }
  0xe8   : > { %v290_v8 = vadd.f32 %v289_v7, %v217_v6  ;;  %v291_v9 = vpop.f32.mrb[1].mxu0 }
  0xe9   : > { %v292_v10 = vadd.f32 %v291_v9, %v217_v6 }
  0xea   : > { %294 = vst [vmem:[%s208_s26] sm:$0xff] %v290_v8 }
  0xeb   : > { %295 = vst [vmem:[%s208_s26 + $0x8] sm:$0xff] %v292_v10 }
  0xec PF: > { %s13_s14 = sadd.s32 1, %s446_s14   ;;  %s513_s12 = smov %s442_s13 }
  0xed   : > { %p10_p5 = scmp.ge.s32.totalorder %s13_s14, 4   ;;  %s514_s13 = smov %s516_s15 }
  0xef   :  { %12 = sbr.rel (!%p10_p5) target bundleno = 2 (0x2), region = 62 }

// kernel: fft_process.3
= control target key start
LH: loop header
LB: loop body
LE: loop exit
PB: predicated region body
PF: predicated region fallthrough
CT: control target
= control target key end

     0   :  { %s2227_s17 = smov 0   ;;  %s2229_s18 = smov 0   ;;  %s2488_s0 = inlined_call_operand.vmem [shape: f32[2,8,256], index: 0, kind: input, shape index: {}]   ;;  %s2489_s1 = inlined_call_operand.vmem [shape: f32[2,8,256], index: 1, kind: input, shape index: {}]   ;;  %s2490_s2 = inlined_call_operand.vmem [shape: f32[2,8,256], index: 2, kind: input, shape index: {}]   ;;  %s2491_s3 = inlined_call_operand.vmem [shape: f32[2,8,256], index: 3, kind: input, shape index: {}]   ;;  %s2492_s4 = inlined_call_operand.vmem [shape: f32[4,8,8], index: 4, kind: input, shape index: {}]   ;;  %s2493_s5 = inlined_call_operand.vmem [shape: f32[4,8,1], index: 5, kind: input, shape index: {}]   ;;  %s2494_s6 = inlined_call_operand.vmem [shape: f32[4,8,8], index: 6, kind: input, shape index: {}]   ;;  %s2495_s7 = inlined_call_operand.vmem [shape: f32[4,8,1], index: 7, kind: input, shape index: {}]   ;;  %s2496_s8 = inlined_call_operand.vmem [shape: f32[2,8,256], index: 8, kind: output, shape index: {0}]   ;;  %s2497_s9 = inlined_call_operand.vmem [shape: f32[2,8,256], index: 9, kind: output, shape index: {1}]   ;;  %s2498_s10 = inlined_call_operand.vmem [shape: f32[2,8,256], index: 10, kind: output, shape index: {2}]   ;;  %s2499_s11 = inlined_call_operand.vmem [shape: f32[2,8,256], index: 11, kind: output, shape index: {3}]  }
   0x1   :  { %s2231_s19 = smov 0   ;;  %s2233_s20 = smov 0  }
   0x2   :  { %s2235_s21 = smov 0   ;;  %s2237_s22 = smov 0  }
   0x3   :  { %s2239_s23 = smov 0  }
   0x4 LB: > { %2504 = sst [smem:[#allocation4_spill]] %s2138_s20  ;;  %s34_s24 = sadd.s32 1, %s2138_s20  ;;  %s2150_s23 = sphi %s2239_s23, %s22_s23   ;;  %s2146_s22 = sphi %s2237_s22, %s2519_s22   ;;  %s2142_s21 = sphi %s2235_s21, %s2518_s21   ;;  %s2138_s20 = sphi %s2233_s20, %s2517_s20   ;;  %s2134_s19 = sphi %s2231_s19, %s2516_s19   ;;  %s2130_s18 = sphi %s2229_s18, %s2515_s18   ;;  %s2126_s17 = sphi %s2227_s17, %s2514_s17  }
   0x5   : > { %2505 = sst [smem:[#allocation5_spill]] %s2142_s21  ;;  %p35_p0 = scmp.ge.s32.totalorder %s34_s24, 2 }
   0x6   : > { %2506 = sst [smem:[#allocation6_spill]] %s2146_s22  ;;  %s37_s25 = sadd.s32 1, %s2142_s21 }
   0x7   : > { %2507 = sst [smem:[#allocation7_spill]] %s2150_s23  ;;  %p1889_p1 = scmp.ge.s32.totalorder %s2150_s23, 1 }
   0x8   : > { %p437_p2 = scmp.lt.s32.totalorder %s2150_s23, 9  ;;  %s2521_s24 = smov (%p35_p0, %s34_s24), 0 }
   0x9   : > { %2508 = sst [smem:[#allocation8_spill]] %s2521_s24  ;;  %s2523_s25 = smov (!%p35_p0, %s37_s25), %s2142_s21 }
   0xa   : > { %p438_p3 = pnand %p1889_p1, %p437_p2  ;;  %p39_p4 = scmp.ge.s32.totalorder %s2523_s25, 2 }
   0xb   : > { %s41_s26 = sadd.s32 1, %s2146_s22  ;;  %s537_s27 = smul.u32 (!%p438_p3), %s2126_s17, %s2130_s18  ;;  %v2152_v0 = vmov (!%p438_p3), 0.0   ;;  %vm2153_vm0 = vmmov (!%p438_p3), 0   ;;  %v1907_v1 = vld [vmem:[%s2493_s5 + $0x8] sm:$0xff] (!%p438_p3)  ;;  %v2154_v2 = vmov (!%p438_p3), 0   ;;  %v1913_v3 = vld [vmem:[%s2493_s5 + $0x10] sm:$0xff] (!%p438_p3)  ;;  %v969_v48 = vlaneseq (!%p438_p3) }
   0xc   : > { %s2525_s25 = smov (%p39_p4, %s2523_s25), 0  ;;  %s2527_s26 = smov (!%p39_p4, %s41_s26), %s2146_s22 }
   0xd   : > { %2509 = sst [smem:[#allocation9_spill]] %s2525_s25  ;;  %p43_p5 = scmp.ge.s32.totalorder %s2527_s26, 2  ;;  %1956 = vmatprep.subr.mxu0 (!%p438_p3), %v2152_v0  ;;  %1958 = vmatprep.mubr.msk.f32.mxu0 (!%p438_p3), %vm2153_vm0, %v2152_v0  ;;  %v1906_v4 = vld [vmem:[%s2492_s4 + $0x8] sm:$0xff] (!%p438_p3)  ;;  %vm623_vm1 = vcmask (!%p438_p3), 64512   ;;  %v1912_v7 = vld [vmem:[%s2492_s4 + $0x10] sm:$0xff] (!%p438_p3)  ;;  %v970_v49 = vand.u32 (!%p438_p3), 127, %v969_v48 }
   0xe   : > { %441 = sbr.rel (%p438_p3) target bundleno = 1406 (0x57e), region = 52  ;;  %p538_p6 = scmp.lt.s32.totalorder (!%p438_p3), %s2134_s19, 1  ;;  %2071 = vset.pattern.permute.xlu0 (!%p438_p3), %v2154_v2  ;;  %1961 = vmatprep.subr.mxu1 (!%p438_p3), %v2152_v0  ;;  %v1910_v8 = vld [vmem:[%s2495_s7 + $0x8] sm:$0xff] (!%p438_p3)  ;;  %v1916_v9 = vld [vmem:[%s2495_s7 + $0x10] sm:$0xff] (!%p438_p3) }
   0xf   : > { %s2529_s26 = smov (%p43_p5, %s2527_s26), 0  ;;  %p549_p7 = scmp.lt.s32.totalorder (!%p438_p3), %s2126_s17, 1  ;;  %620 = vperm.xlu0 (!%p438_p3), %2071, %v1907_v1   ;;  %1963 = vmatprep.mubr.msk.f32.mxu1 (!%p438_p3), %vm2153_vm0, %v2152_v0  ;;  %v1909_v20 = vld [vmem:[%s2494_s6 + $0x8] sm:$0xff] (!%p438_p3)  ;;  %v1915_v23 = vld [vmem:[%s2494_s6 + $0x10] sm:$0xff] (!%p438_p3) }
  0x10   : > { %2510 = sst [smem:[#allocation10_spill]] %s2529_s26  ;;  %p540_p8 = scmp.lt.s32.totalorder (!%p438_p3), %s537_s27, 1  ;;  %2072 = vset.pattern.permute.xlu1 (!%p438_p3), %v2154_v2 }
  0x11   : > { %705 = vperm.xlu1 (!%p438_p3), %2072, %v1910_v8   ;;  %p976_p9 = scmp.eq.s32.totalorder (!%p438_p3), %s2130_s18, 0  ;;  %p977_p10 = scmp.eq.s32.totalorder (!%p438_p3), %s2126_s17, 0 }
  0x13   : > { %788 = vperm.xlu0 (!%p438_p3), %2071, %v1913_v3   ;;  %p2345_p11 = pnand (!%p438_p3), %p977_p10, %p976_p9 }
  0x15   : > { %s2531_s19 = smov (!%p538_p6, %s2134_s19), 1  ;;  %s2533_s27 = smov (!%p540_p8, %s537_s27), 1  ;;  %872 = vperm.xlu1 %2072, %v1916_v9  }
  0x16   : > { %s1890_s30 = sshll.u32 %s2531_s19, 1  ;;  %vm982_vm3 = vcmask (!%p2345_p11), 7168   ;;  %v2155_v58 = vmov (!%p2345_p11), -1e+30   ;;  %v2156_v59 = vmov (!%p2345_p11), 0.0  }
  0x17   : > { %s550_s14 = scalar_select %p549_p7, %s2126_s17, 1 }
  0x18   : > { %s543_s15 = sadd.s32 %s1890_s30, %s2533_s27  ;;  %983 = vst.msk [vmem:[#allocation2] sm:$0xff] (!%p2345_p11), %vm982_vm3, %v2155_v58  ;;  %984 = vst.msk [vmem:[#allocation3] sm:$0xff] (!%p2345_p11), %vm982_vm3, %v2156_v59 }
  0x19   : > { %s2287_s16 = sshll.u32 %s543_s15, 3  ;;  %s552_s28 = sadd.s32 %s1890_s30, %s550_s14 }
  0x1a   : > { %s1893_s13 = sshll.u32 %s552_s28, 3  ;;  %s571_s14 = scalar_lea.vmem %s2491_s3, %s2287_s16 }
  0x1b   : > { %s554_s24 = scalar_lea.vmem %s2489_s1, %s1893_s13  ;;  %s562_s15 = scalar_lea.vmem %s2490_s2, %s1893_s13 }
  0x1c   : > { %s581_s28 = scalar_lea.vmem %s2496_s8, %s2287_s16  ;;  %v613_v5 = vld [vmem:[%s554_s24] sm:$0xff]  ;;  %s591_s22 = scalar_lea.vmem %s2497_s9, %s2287_s16 }
  0x1d   : > { %v781_v6 = vld [vmem:[%s562_s15] sm:$0xff]  ;;  %s601_s20 = scalar_lea.vmem %s2498_s10, %s2287_s16  ;;  %1957 = vmatpush3.msra.mxu0 %v613_v5  ;;  %s611_s23 = scalar_lea.vmem %s2499_s11, %s2287_s16 }
  0x1e   : > { %1959 = vmatmul.mubr.msk.f32.vlgmr.msra.gmra.mrb[0].mxu0 %vm623_vm1, %v1906_v4  ;;  %1966 = vmatprep.subr.mxu0 %v2152_v0  ;;  %s1918_s24 = sshll.u32 %s2126_s17, 7 }
  0x1f   : > { %1967 = vmatpush3.msra.mxu0 %v781_v6  ;;  %1968 = vmatprep.mubr.msk.f32.mxu0 %vm2153_vm0, %v2152_v0  ;;  %v972_v50 = vstv %s1918_s24 }
  0x20   : > { %v973_v52 = vadd.s32 %v972_v50, %v970_v49 }
  0x22   : > { %1969 = vmatmul.mubr.msk.f32.vlgmr.msra.gmra.mrb[2].mxu0 %vm623_vm1, %v1912_v7  ;;  %vm974_vm2 = vcmp.lt.s32.totalorder %v973_v52, 144 }
  0x8e   : > { %v621_v10 = vpop.permute.xlu0 %620 }
  0x90   : > { %v706_v24 = vpop.permute.xlu1 %705 }
  0x92   : > { %v789_v15 = vpop.permute.xlu0 %788 }
  0x94   : > { %v873_v29 = vpop.permute.xlu1 %872 }
  0xf1   : > { %v693_v11 = vpop.f32.mrb[0].mxu0 }
  0xf2   : > { %v694_v12 = vadd.f32 %v693_v11, %v621_v10  ;;  %v1960_v13 = vpop.f32.mrb[1].mxu0 }
  0xf4   : > { %v697_v14 = vmul.f32 0.1, %v694_v12 }
  0xf5   : > { %v860_v16 = vpop.f32.mrb[2].mxu0 }
  0xf6   : > { %v861_v17 = vadd.f32 %v860_v16, %v789_v15  ;;  %v1970_v18 = vpop.f32.mrb[3].mxu0  ;;  %v698_v19 = vmax.f32 %v694_v12, %v697_v14 }
  0xf8   : > { %v864_v21 = vmul.f32 0.1, %v861_v17  ;;  %1962 = vmatpush3.msra.mxu1 %v698_v19 }
  0xf9   : > { %1964 = vmatmul.mubr.msk.f32.vlgmr.msra.gmra.mrb[0].mxu1 %vm623_vm1, %v1909_v20  ;;  %1971 = vmatprep.subr.mxu1 %v2152_v0 }
  0xfa   : > { %v865_v22 = vmax.f32 %v861_v17, %v864_v21  ;;  %1973 = vmatprep.mubr.msk.f32.mxu1 %vm2153_vm0, %v2152_v0 }
  0xfc   : > { %1972 = vmatpush3.msra.mxu1 %v865_v22 }
  0xfd   : > { %1974 = vmatmul.mubr.msk.f32.vlgmr.msra.gmra.mrb[2].mxu1 %vm623_vm1, %v1915_v23 }
 0x1cc   : > { %v777_v25 = vpop.f32.mrb[0].mxu1 }
 0x1cd   : > { %v778_v26 = vadd.f32 %v777_v25, %v706_v24  ;;  %v1965_v27 = vpop.f32.mrb[1].mxu1 }
 0x1cf   : > { %v948_v28 = vmul.f32 %v778_v26, %v778_v26 }
 0x1d0   : > { %v944_v30 = vpop.f32.mrb[2].mxu1 }
 0x1d1   : > { %v949_v31 = vrot.slane %v948_v28, 4  ;;  %v2349_v32 = vadd.f32 %v944_v30, %v873_v29  ;;  %v1975_v33 = vpop.f32.mrb[3].mxu1 }
 0x1d3   : > { %v950_v34 = vadd.f32 %v949_v31, %v948_v28  ;;  %v958_v35 = vmul.f32 %v2349_v32, %v2349_v32 }
 0x1d5   : > { %v951_v36 = vrot.slane %v950_v34, 2  ;;  %v959_v37 = vrot.slane %v958_v35, 4 }
 0x1d7   : > { %v952_v38 = vadd.f32 %v951_v36, %v950_v34  ;;  %v960_v39 = vadd.f32 %v959_v37, %v958_v35 }
 0x1d9   : > { %v953_v40 = vrot.slane %v952_v38, 1  ;;  %v961_v41 = vrot.slane %v960_v39, 2 }
 0x1db   : > { %v954_v42 = vadd.f32 %v953_v40, %v952_v38  ;;  %v962_v43 = vadd.f32 %v961_v41, %v960_v39 }
 0x1dd   : > { %v955_v44 = vmax.f32 %v954_v42, 1e-24  ;;  %v963_v45 = vrot.slane %v962_v43, 1 }
 0x1df   : > { %v964_v46 = vadd.f32 %v963_v45, %v962_v43  ;;  %2073 = vrsqrt.f32 %v955_v44 }
 0x1e1   : > { %v965_v47 = vmax.f32 %v964_v46, 1e-24 }
 0x1e3   : > { %2075 = vrsqrt.f32 %v965_v47 }
 0x1e9   : > { %v2074_v51 = vpop.eup %2073 }
 0x1ea   : > { %v2354_v54 = vmul.f32 %v2074_v51, %v778_v26 }
 0x1ec   : > { %981 = sbr.rel (%p2345_p11) target bundleno = 499 (0x1f3), region = 56 }
 0x1ed   : > { %v2076_v53 = vpop.eup %2075 }
 0x1ee   : > { %v967_v55 = vmul.f32 %v2076_v53, %v2349_v32 }
 0x1f0   : > { %v968_v56 = vmul.f32 %v967_v55, %v2354_v54 }
 0x1f2   : > { %v2358_v57 = vsel %vm974_vm2, %v968_v56, -1e+30 }
 0x1f3 PF: > { %p1919_p12 = scmp.ne.s32.totalorder %s2130_s18, 0 }
 0x1f4   : > { %989 = vmax.xlane.f32.xlu0 (!%p1919_p12), %v2358_v57  ;;  %v2157_v60 = vmov (!%p1919_p12), 0   ;;  %v988_v61 = vld [vmem:[#allocation2] sm:$0xff] (!%p1919_p12)  ;;  %vm1008_vm4 = vcmask (!%p1919_p12), 7168   ;;  %v992_v7 = vld [vmem:[#allocation3] sm:$0xff] (!%p1919_p12) }
 0x1f5   : > { %987 = sbr.rel (%p1919_p12) target bundleno = 932 (0x3a4), region = 60  ;;  %2077 = vset.pattern.permute.xlu0 (!%p1919_p12), %v2157_v60 }
 0x281   : > { %v990_v62 = vpop.xlane.xlu0 %989 }
 0x282   : > { %v991_v63 = vmax.f32 %v988_v61, %v990_v62 }
 0x284   : > { %v993_v0 = vsub.f32 %v988_v61, %v991_v63  ;;  %1010 = vst.msk [vmem:[#allocation2] sm:$0xff] %vm1008_vm4, %v991_v63  ;;  %999 = vperm.xlu0 %2077, %v991_v63  }
 0x286   : > { %v994_v5 = vmul.f32 1.442695, %v993_v0 }
 0x303   : > { %v1000_v1 = vpop.permute.xlu0 %999 }
 0x304   : > { %v1002_v2 = vsub.f32 %v2358_v57, %v1000_v1 }
 0x306   : > { %v1003_v3 = vmul.f32 1.442695, %v1002_v2 }
 0x308   : > { %2078 = vpow2.f32 %v1003_v3 }
 0x309   : > { %2080 = vpow2.f32 %v994_v5 }
 0x312   : > { %v2079_v4 = vpop.eup %2078 }
 0x313   : > { %1005 = vadd.xlane.f32.xlu1 %v2079_v4  ;;  %v2081_v6 = vpop.eup %2080 }
 0x314   : > { %v996_v8 = vmul.f32 %v2081_v6, %v992_v7 }
 0x3a0   : > { %v1006_v9 = vpop.xlane.xlu1 %1005 }
 0x3a1   : > { %v1007_v10 = vadd.f32 %v1006_v9, %v996_v8 }
 0x3a3   : > { %1009 = vst.msk [vmem:[#allocation3] sm:$0xff] %vm1008_vm4, %v1007_v10 }
 0x3a4 PF: > { %p1920_p13 = scmp.ne.s32.totalorder %s2130_s18, 1 }
 0x3a5   : > { %s2512_s30 = scalar_lea.vmem (!%p1920_p13), %s2488_s0, %s2287_s16  ;;  %v1016_v12 = vld [vmem:[%s2492_s4] sm:$0xff] (!%p1920_p13)  ;;  %1583 = vst [vmem:[%s601_s20] sm:$0xff] (!%p1920_p13), %v2349_v32  ;;  %v2158_v13 = vmov (!%p1920_p13), 0.0   ;;  %vm2159_vm5 = vmmov (!%p1920_p13), 0   ;;  %v2160_v15 = vmov (!%p1920_p13), 0   ;;  %v1923_v18 = vld [vmem:[%s2492_s4 + $0x18] sm:$0xff] (!%p1920_p13) }
 0x3a6   : > { %1014 = sbr.rel (%p1920_p13) target bundleno = 1406 (0x57e), region = 64  ;;  %v1015_v11 = vld [vmem:[%s2512_s30] sm:$0xff] (!%p1920_p13)  ;;  %1976 = vmatprep.subr.mxu0 (!%p1920_p13), %v2158_v13  ;;  %1978 = vmatprep.mubr.msk.f32.mxu0 (!%p1920_p13), %vm2159_vm5, %v2158_v13  ;;  %v1924_v19 = vld [vmem:[%s2493_s5 + $0x18] sm:$0xff] (!%p1920_p13)  ;;  %v2161_v53 = vmov (!%p1920_p13), 2102212464  }
 0x3a7   : > { %v1178_v14 = vld [vmem:[%s571_s14] sm:$0xff] (!%p1920_p13)  ;;  %1977 = vmatpush3.msra.mxu0 (!%p1920_p13), %v1015_v11  ;;  %2082 = vset.pattern.permute.xlu0 (!%p1920_p13), %v2160_v15  ;;  %v1927_v21 = vld [vmem:[%s2495_s7 + $0x18] sm:$0xff] (!%p1920_p13)  ;;  %v2162_v56 = vmov (!%p1920_p13), 920167782   ;;  %v2163_v61 = vmov (!%p1920_p13), 1326507024  }
 0x3a8   : > { %v1017_v16 = vld [vmem:[%s2493_s5] sm:$0xff] (!%p1920_p13)  ;;  %1979 = vmatmul.mubr.msk.f32.vlgmr.msra.gmra.mrb[0].mxu0 (!%p1920_p13), %vm623_vm1, %v1016_v12  ;;  %1986 = vmatprep.subr.mxu0 (!%p1920_p13), %v2158_v13  ;;  %v1926_v36 = vld [vmem:[%s2494_s6 + $0x18] sm:$0xff] (!%p1920_p13)  ;;  %v2164_v62 = vmov (!%p1920_p13), 683565275   ;;  %v2165_v0 = vmov (!%p1920_p13), 2475754826  }
 0x3a9   : > { %v1351_v17 = vld [vmem:[#allocation2] sm:$0xff] (!%p1920_p13)  ;;  %1987 = vmatpush3.msra.mxu0 (!%p1920_p13), %v1178_v14  ;;  %1988 = vmatprep.mubr.msk.f32.mxu0 (!%p1920_p13), %vm2159_vm5, %v2158_v13  ;;  %v2166_v3 = vmov (!%p1920_p13), 2131351028  }
 0x3aa   : > { %1020 = vperm.xlu0 (!%p1920_p13), %2082, %v1017_v16   ;;  %2083 = vset.pattern.permute.xlu1 (!%p1920_p13), %v2160_v15  ;;  %v1360_v20 = vld [vmem:[#allocation3] sm:$0xff] (!%p1920_p13)  ;;  %v1099_v22 = vld [vmem:[%s2495_s7] sm:$0xff] (!%p1920_p13) }
 0x3ab   : > { %1354 = vperm.xlu1 (!%p1920_p13), %2083, %v1351_v17   ;;  %1981 = vmatprep.subr.mxu1 (!%p1920_p13), %v2158_v13  ;;  %v1098_v33 = vld [vmem:[%s2494_s6] sm:$0xff] (!%p1920_p13) }
 0x3ac   : > { %1989 = vmatmul.mubr.msk.f32.vlgmr.msra.gmra.mrb[2].mxu0 (!%p1920_p13), %vm623_vm1, %v1923_v18  ;;  %1983 = vmatprep.mubr.msk.f32.mxu1 (!%p1920_p13), %vm2159_vm5, %v2158_v13 }
 0x3ae   : > { %1185 = vperm.xlu0 %2082, %v1924_v19  }
 0x3af   : > { %1363 = vperm.xlu1 %2083, %v1360_v20  }
 0x3b2   : > { %1269 = vperm.xlu0 %2082, %v1927_v21  }
 0x3b3   : > { %1102 = vperm.xlu1 %2083, %v1099_v22  }
 0x429   : > { %v1021_v23 = vpop.permute.xlu0 %1020 }
 0x42a   : > { %v1355_v37 = vpop.permute.xlu1 %1354 }
 0x42b   : > { %v1357_v38 = vsub.f32 %v2358_v57, %v1355_v37 }
 0x42d   : > { %v1186_v28 = vpop.permute.xlu0 %1185  ;;  %v1358_v39 = vmul.f32 1.442695, %v1357_v38 }
 0x42e   : > { %v1364_v40 = vpop.permute.xlu1 %1363 }
 0x42f   : > { %2084 = vpow2.f32 %v1358_v39 }
 0x430   : > { %2086 = vrcp.f32 %v1364_v40 }
 0x439   : > { %v2085_v41 = vpop.eup %2084 }
 0x43a   : > { %v2087_v42 = vpop.eup %2086 }
 0x43b   : > { %v1367_v43 = vmul.f32 %v2087_v42, %v2085_v41 }
 0x43d   : > { %v1368_v44 = vmul.f32 %v1367_v43, %v2354_v54 }
 0x43f   : > { %v2419_v45 = vadd.f32 %v1368_v44, %v2354_v54 }
 0x441   : > { %v1375_v46 = vand.u32 2139095040, %v2419_v45  ;;  %v1372_v58 = vand.u32 2147483647, %v2419_v45  ;;  %vm1374_vm13 = vcmp.lt.s32.totalorder %v2419_v45, 0 }
 0x443   : > { %v1376_v47 = vshrl.u32 %v1375_v46, 23  ;;  %v1379_v8 = vand.u32 8388607, %v1372_v58  ;;  %vm1373_vm14 = vcmp.le.f32.partialorder %v1372_v58, 0.7853982 }
 0x445   : > { %v1930_v48 = vadd.s32 4294967169, %v1376_v47  ;;  %v1380_v14 = vor.u32 8388608, %v1379_v8 }
 0x447   : > { %v1382_v49 = vadd.s32 1, %v1930_v48  ;;  %v1420_v20 = vshll.u32 %v1380_v14, 8 }
 0x449   : > { %vm1383_vm6 = vcmp.gt.s32.totalorder %v1382_v49, 0 }
 0x44a   : > { %v1384_v50 = vsel %vm1383_vm6, %v1382_v49, 0 }
 0x44b   : > { %v1386_v51 = vand.u32 31, %v1384_v50  ;;  %v1385_v59 = vshrl.u32 %v1384_v50, 5 }
 0x44d   : > { %v1387_v52 = vsub.s32 32, %v1386_v51  ;;  %v1398_v55 = vshll.u32 %v2161_v53, %v1386_v51  ;;  %v1401_v60 = vshll.u32 %v2162_v56, %v1386_v51  ;;  %v1389_v63 = vshll.u32 %v2164_v62, %v1386_v51 }
 0x44e   : > { %v1392_v1 = vshll.u32 %v2165_v0, %v1386_v51  ;;  %v1395_v5 = vshll.u32 %v2166_v3, %v1386_v51  ;;  %vm1407_vm7 = vcmp.lt.s32.totalorder %v1385_v59, 4  ;;  %vm1404_vm8 = vcmp.lt.s32.totalorder %v1385_v59, 1 }
 0x44f   : > { %v1399_v57 = vshrl.u32 %v2162_v56, %v1387_v52  ;;  %v1402_v54 = vshrl.u32 %v2163_v61, %v1387_v52  ;;  %v1390_v2 = vshrl.u32 %v2165_v0, %v1387_v52  ;;  %v1393_v4 = vshrl.u32 %v2166_v3, %v1387_v52 }
 0x450   : > { %v1396_v6 = vshrl.u32 %v2161_v53, %v1387_v52  ;;  %vm1406_vm9 = vcmp.lt.s32.totalorder %v1385_v59, 3  ;;  %vm1405_vm10 = vcmp.lt.s32.totalorder %v1385_v59, 2 }
 0x451   : > { %v1400_v7 = vor.u32 %v1399_v57, %v1398_v55  ;;  %v1403_v9 = vor.u32 %v1402_v54, %v1401_v60  ;;  %v1391_v10 = vor.u32 %v1390_v2, %v1389_v63  ;;  %v1394_v11 = vor.u32 %v1393_v4, %v1392_v1 }
 0x452   : > { %v1397_v12 = vor.u32 %v1396_v6, %v1395_v5 }
 0x453   : > { %v1417_v15 = vsel %vm1407_vm7, %v1403_v9, 1326507024  ;;  %v1412_v16 = vsel %vm1404_vm8, %v1391_v10, %v1394_v11 }
 0x454   : > { %v1416_v18 = vsel %vm1404_vm8, %v1394_v11, %v1397_v12  ;;  %v1418_v19 = vsel %vm1406_vm9, %v1400_v7, %v1417_v15 }
 0x455   : > { %v1419_v22 = vsel %vm1405_vm10, %v1416_v18, %v1418_v19 }
 0x47b   : > { %v1092_v24 = vpop.f32.mrb[0].mxu0 }
 0x47c   : > { %v1093_v25 = vadd.f32 %v1092_v24, %v1021_v23  ;;  %v1980_v26 = vpop.f32.mrb[1].mxu0 }
 0x47e   : > { %v1096_v27 = vmul.f32 0.1, %v1093_v25 }
 0x47f   : > { %v1257_v29 = vpop.f32.mrb[2].mxu0 }
 0x480   : > { %v1258_v30 = vadd.f32 %v1257_v29, %v1186_v28  ;;  %v1990_v31 = vpop.f32.mrb[3].mxu0  ;;  %v1097_v32 = vmax.f32 %v1093_v25, %v1096_v27  ;;  %v1388_v25 = vshrl.u32 %v2164_v62, %v1387_v52  ;;  %v1409_v28 = vsel %vm1407_vm7, %v1397_v12, 2102212464  ;;  %v1270_v62 = vpop.permute.xlu0 %1269 }
 0x481   : > { %v2436_v26 = vmul.u32.u64.low %v1420_v20, %v1419_v22  ;;  %v2437_v27 = vmul.u32.u64.high %v1420_v20, %v1419_v22, %v2436_v26 }
 0x482   : > { %v1261_v34 = vmul.f32 0.1, %v1258_v30  ;;  %1982 = vmatpush3.msra.mxu1 %v1097_v32  ;;  %v1408_v29 = vsel %vm1404_vm8, %v1388_v25, %v1391_v10 }
 0x483   : > { %1984 = vmatmul.mubr.msk.f32.vlgmr.msra.gmra.mrb[0].mxu1 %vm623_vm1, %v1098_v33  ;;  %1991 = vmatprep.subr.mxu1 %v2158_v13 }
 0x484   : > { %v1262_v35 = vmax.f32 %v1258_v30, %v1261_v34  ;;  %1993 = vmatprep.mubr.msk.f32.mxu1 %vm2159_vm5, %v2158_v13  ;;  %v1413_v13 = vsel %vm1407_vm7, %v1400_v7, 920167782  ;;  %v1410_v30 = vsel %vm1406_vm9, %v1394_v11, %v1409_v28  ;;  %vm1464_vm5 = vweird.f32 %v2419_v45 }
 0x485   : > { %v1414_v17 = vsel %vm1406_vm9, %v1397_v12, %v1413_v13  ;;  %v1411_v31 = vsel %vm1405_vm10, %v1408_v29, %v1410_v30 }
 0x486   : > { %1992 = vmatpush3.msra.mxu1 %v1262_v35  ;;  %v1415_v21 = vsel %vm1405_vm10, %v1412_v16, %v1414_v17  ;;  %v1427_v33 = vmul.u32 %v1420_v20, %v1411_v31  ;;  %v1103_v17 = vpop.permute.xlu1 %1102 }
 0x487   : > { %1994 = vmatmul.mubr.msk.f32.vlgmr.msra.gmra.mrb[2].mxu1 %vm623_vm1, %v1926_v36  ;;  %v2433_v23 = vmul.u32.u64.low %v1420_v20, %v1415_v21  ;;  %v2434_v24 = vmul.u32.u64.high %v1420_v20, %v1415_v21, %v2433_v23 }
 0x489   : > { %v1430_v32 = vadd.s32 1, %v2434_v24  ;;  %vm1429_vm11 = vc.u32 %v2437_v27, %v2433_v23  ;;  %v1428_v47 = vadd.s32 %v2433_v23, %v2437_v27 }
 0x48b   : > { %v1431_v34 = vsel %vm1429_vm11, %v1430_v32, %v2434_v24 }
 0x48c   : > { %v1432_v35 = vadd.s32 %v1431_v34, %v1427_v33 }
 0x48e   : > { %v1433_v36 = vadd.s32 536870912, %v1432_v35 }
 0x490   : > { %v1434_v37 = vshrl.u32 %v1433_v36, 30 }
 0x492   : > { %v1435_v38 = vshll.u32 %v1434_v37, 30  ;;  %v1458_v4 = vsub.s32 4, %v1434_v37 }
 0x494   : > { %v1436_v39 = vsub.s32 %v1432_v35, %v1435_v38  ;;  %v1459_v6 = vsel %vm1374_vm13, %v1458_v4, %v1434_v37 }
 0x495   : > { %v1461_v7 = vsel %vm1373_vm14, 0, %v1459_v6 }
 0x496   : > { %v1438_v40 = vsub.s32 0, %v1436_v39  ;;  %v1570_v9 = vadd.s32 3, %v1461_v7  ;;  %v1465_v12 = vand.u32 3, %v1461_v7 }
 0x498   : > { %v1931_v41 = vmin.u32 %v1438_v40, %v1436_v39  ;;  %v1571_v14 = vand.u32 3, %v1570_v9  ;;  %vm1467_vm15 = vcmp.eq.s32.totalorder %v1465_v12, 0  ;;  %vm1470_vm0 = vcmp.eq.s32.totalorder %v1465_v12, 2 }
 0x499   : > { %vm1466_vm3 = vcmp.lt.s32.totalorder %v1465_v12, 2 }
 0x49a   : > { %v1440_v42 = vclz %v1931_v41  ;;  %vm1573_vm1 = vcmp.eq.s32.totalorder %v1571_v14, 0  ;;  %vm1576_vm2 = vcmp.eq.s32.totalorder %v1571_v14, 2  ;;  %vm1572_vm4 = vcmp.lt.s32.totalorder %v1571_v14, 2 }
 0x49c   : > { %v1932_v43 = vadd.s32 4294967294, %v1440_v42 }
 0x49e   : > { %vm1933_vm12 = vcmp.lt.s32.totalorder %v1932_v43, 0 }
 0x49f   : > { %v1443_v44 = vsel %vm1933_vm12, 0, %v1932_v43 }
 0x4a0   : > { %v1448_v46 = vsub.s32 4294967266, %v1443_v44  ;;  %v1444_v48 = vsub.s32 32, %v1443_v44  ;;  %v1445_v50 = vshll.u32 %v1436_v39, %v1443_v44 }
 0x4a2   : > { %v1449_v49 = vadd.s32 127, %v1448_v46  ;;  %v1446_v51 = vshrl.u32 %v1428_v47, %v1444_v48 }
 0x4a4   : > { %v1450_v52 = vshll.u32 %v1449_v49, 23  ;;  %v1447_v53 = vor.u32 %v1446_v51, %v1445_v50 }
 0x4a6   : > { %v1451_v55 = vor.u32 4788187, %v1450_v52  ;;  %v1454_v57 = vcvt.s32.f32 %v1447_v53 }
 0x4a8   : > { %v1452_v56 = vand.u32 2147483647, %v1451_v55 }
 0x4aa   : > { %v1455_v59 = vmul.f32 %v1454_v57, %v1452_v56 }
 0x4ac   : > { %v1456_v54 = vxor.u32 2147483648, %v1455_v59 }
 0x4ae   : > { %v1457_v2 = vsel %vm1374_vm13, %v1456_v54, %v1455_v59 }
 0x4af   : > { %v1460_v5 = vsel %vm1373_vm14, %v2419_v45, %v1457_v2 }
 0x556   : > { %v1174_v60 = vpop.f32.mrb[0].mxu1 }
 0x557   : > { %v1985_v61 = vpop.f32.mrb[1].mxu1  ;;  %v1175_v21 = vadd.f32 %v1174_v60, %v1103_v17 }
 0x55a   : > { %v1341_v63 = vpop.f32.mrb[2].mxu1 }
 0x55b   : > { %v1342_v0 = vadd.f32 %v1341_v63, %v1270_v62  ;;  %v1995_v1 = vpop.f32.mrb[3].mxu1 }
 0x55d   : > { %v1929_v3 = vmul.f32 -1.442695, %v1342_v0 }
 0x55f   : > { %2088 = vpow2.f32 %v1929_v3 }
 0x560   : > { %2090 = vsinq.f32 %v1460_v5 }
 0x561   : > { %2092 = vcosq.f32 %v1460_v5 }
 0x569   : > { %v2089_v8 = vpop.eup %2088 }
 0x56a   : > { %v1348_v10 = vadd.f32 1.0, %v2089_v8  ;;  %v2091_v11 = vpop.eup %2090 }
 0x56b   : > { %v2093_v13 = vpop.eup %2092  ;;  %v1468_v15 = vxor.u32 2147483648, %v2091_v11 }
 0x56c   : > { %2094 = vrcp.f32 %v1348_v10  ;;  %v1471_v58 = vxor.u32 2147483648, %v2093_v13 }
 0x56d   : > { %v1469_v16 = vsel %vm1467_vm15, %v2093_v13, %v1468_v15  ;;  %v1575_v19 = vsel %vm1573_vm1, %v2093_v13, %v1468_v15 }
 0x56e   : > { %v1472_v18 = vsel %vm1470_vm0, %v1471_v58, %v2091_v11  ;;  %v1578_v20 = vsel %vm1576_vm2, %v1471_v58, %v2091_v11 }
 0x56f   : > { %v1473_v24 = vsel %vm1466_vm3, %v1469_v16, %v1472_v18  ;;  %v1579_v25 = vsel %vm1572_vm4, %v1575_v19, %v1578_v20 }
 0x570   : > { %v1474_v27 = vsel %vm1464_vm5, nan, %v1473_v24  ;;  %v1580_v28 = vsel %vm1464_vm5, nan, %v1579_v25 }
 0x576   : > { %v2095_v22 = vpop.eup %2094 }
 0x577   : > { %v1370_v23 = vmul.f32 %v2095_v22, %v1175_v21  ;;  %1584 = vst [vmem:[%s611_s23] sm:$0xff] %v2095_v22 }
 0x579   : > { %v1371_v26 = vadd.f32 %v1370_v23, %v1175_v21 }
 0x57b   : > { %v1475_v29 = vmul.f32 %v1474_v27, %v1371_v26  ;;  %v1581_v30 = vmul.f32 %v1580_v28, %v1371_v26 }
 0x57d   : > { %1476 = vst [vmem:[%s581_s28] sm:$0xff] %v1475_v29  ;;  %1582 = vst [vmem:[%s591_s22] sm:$0xff] %v1581_v30 }
 0x57e PF: > { %s2513_s24 = sld [smem:[#allocation7_spill]]  ;;  %s2514_s17 = sld [smem:[#allocation4_spill]] }
 0x57f   : > { %s2515_s18 = sld [smem:[#allocation5_spill]]  ;;  %s2516_s19 = sld [smem:[#allocation6_spill]] }
 0x580   : > { %s2517_s20 = sld [smem:[#allocation8_spill]]  ;;  %s2518_s21 = sld [smem:[#allocation9_spill]] }
 0x581   : > { %s2519_s22 = sld [smem:[#allocation10_spill]] }
 0x584   : > { %s22_s23 = sadd.s32 1, %s2513_s24  }
 0x585   : > { %p19_p0 = scmp.ge.s32.totalorder %s22_s23, 10  }
 0x587   :  { %21 = sbr.rel (!%p19_p0) target bundleno = 4 (0x4), region = 151 }

// kernel: reverse.1
= control target key start
LH: loop header
LB: loop body
LE: loop exit
PB: predicated region body
PF: predicated region fallthrough
CT: control target
= control target key end

     0   :  { %v103_v3 = vlaneseq  ;;  %v96_v18 = vld [vmem:[#allocation0 + $0x7] ss:$-1 sm:$0xff]  ;;  %v110_v19 = vld [vmem:[#allocation0 + $0x17] ss:$-1 sm:$0xff]  ;;  %s604_s0 = inlined_call_operand.vmem [shape: f32[2,8,16,7], index: 0, kind: input, shape index: {}]   ;;  %s605_s1 = inlined_call_operand.vmem [shape: f32[2,8,16,7], index: 1, kind: output, shape index: {}]  }
   0x1   :  { %v60_v0 = vld [vmem:[%s604_s0] sm:$0xff]  ;;  %v62_v1 = vld [vmem:[%s604_s0 + $0x8] sm:$0xff]  ;;  %v64_v2 = vld [vmem:[%s604_s0 + $0x10] sm:$0xff]  ;;  %v97_v20 = vrot.slane %v96_v18, 1  ;;  %v111_v21 = vrot.slane %v110_v19, 1 }
   0x2   :  { %61 = vst [vmem:[#allocation0 + $0x8] sm:$0xff] %v60_v0  ;;  %63 = vst [vmem:[#allocation0 + $0x18] sm:$0xff] %v62_v1  ;;  %v66_v4 = vld [vmem:[%s604_s0 + $0x18] sm:$0xff]  ;;  %v68_v5 = vld [vmem:[%s604_s0 + $0x20] sm:$0xff]  ;;  %v500_v10 = vshrl.u32 %v103_v3, 7 }
   0x3   :  { %65 = vst [vmem:[#allocation0 + $0x28] sm:$0xff] %v64_v2  ;;  %v70_v6 = vld [vmem:[%s604_s0 + $0x28] sm:$0xff]  ;;  %67 = vst [vmem:[#allocation0 + $0x38] sm:$0xff] %v66_v4  ;;  %v72_v7 = vld [vmem:[%s604_s0 + $0x30] sm:$0xff] }
   0x4   :  { %69 = vst [vmem:[#allocation0 + $0x48] sm:$0xff] %v68_v5  ;;  %71 = vst [vmem:[#allocation0 + $0x58] sm:$0xff] %v70_v6  ;;  %v74_v8 = vld [vmem:[%s604_s0 + $0x38] sm:$0xff]  ;;  %v76_v9 = vld [vmem:[%s604_s0 + $0x40] sm:$0xff]  ;;  %vm105_vm0 = vcmp.lt.s32.totalorder %v500_v10, 7 }
   0x5   :  { %73 = vst [vmem:[#allocation0 + $0x68] sm:$0xff] %v72_v7  ;;  %75 = vst [vmem:[#allocation0 + $0x78] sm:$0xff] %v74_v8  ;;  %v78_v11 = vld [vmem:[%s604_s0 + $0x48] sm:$0xff]  ;;  %v80_v12 = vld [vmem:[%s604_s0 + $0x50] sm:$0xff] }
   0x6   :  { %77 = vst [vmem:[#allocation0 + $0x88] sm:$0xff] %v76_v9  ;;  %v82_v13 = vld [vmem:[%s604_s0 + $0x58] sm:$0xff]  ;;  %79 = vst [vmem:[#allocation0 + $0x98] sm:$0xff] %v78_v11  ;;  %v84_v14 = vld [vmem:[%s604_s0 + $0x60] sm:$0xff] }
   0x7   :  { %81 = vst [vmem:[#allocation0 + $0xa8] sm:$0xff] %v80_v12  ;;  %83 = vst [vmem:[#allocation0 + $0xb8] sm:$0xff] %v82_v13  ;;  %v86_v15 = vld [vmem:[%s604_s0 + $0x68] sm:$0xff]  ;;  %v88_v16 = vld [vmem:[%s604_s0 + $0x70] sm:$0xff] }
   0x8   :  { %85 = vst [vmem:[#allocation0 + $0xc8] sm:$0xff] %v84_v14  ;;  %87 = vst [vmem:[#allocation0 + $0xd8] sm:$0xff] %v86_v15  ;;  %v90_v17 = vld [vmem:[%s604_s0 + $0x78] sm:$0xff]  ;;  %v124_v22 = vld [vmem:[#allocation0 + $0x27] ss:$-1 sm:$0xff] }
   0x9   :  { %89 = vst [vmem:[#allocation0 + $0xe8] sm:$0xff] %v88_v16  ;;  %91 = vst [vmem:[#allocation0 + $0xf8] sm:$0xff] %v90_v17  ;;  %v138_v23 = vld [vmem:[#allocation0 + $0x37] ss:$-1 sm:$0xff]  ;;  %v125_v24 = vrot.slane %v124_v22, 1 }
   0xa   :  { %v139_v25 = vrot.slane %v138_v23, 1  ;;  %v152_v26 = vld [vmem:[#allocation0 + $0x47] ss:$-1 sm:$0xff]  ;;  %v166_v27 = vld [vmem:[#allocation0 + $0x57] ss:$-1 sm:$0xff]  ;;  %98 = vst [vmem:[#allocation1] sm:$0xff] %v97_v20 }
   0xb   :  { %v101_v28 = vld [vmem:[#allocation0 + $0xf] ss:$-1 sm:$0xff]  ;;  %112 = vst [vmem:[#allocation1 + $0x8] sm:$0xff] %v111_v21  ;;  %v115_v29 = vld [vmem:[#allocation0 + $0x1f] ss:$-1 sm:$0xff]  ;;  %126 = vst [vmem:[#allocation1 + $0x10] sm:$0xff] %v125_v24 }
   0xc   :  { %v129_v30 = vld [vmem:[#allocation0 + $0x2f] ss:$-1 sm:$0xff]  ;;  %v102_v31 = vrot.slane %v101_v28, 1  ;;  %v116_v32 = vrot.slane %v115_v29, 1  ;;  %140 = vst [vmem:[#allocation1 + $0x18] sm:$0xff] %v139_v25  ;;  %v153_v35 = vrot.slane %v152_v26, 1 }
   0xd   :  { %v130_v33 = vrot.slane %v129_v30, 1  ;;  %v143_v34 = vld [vmem:[#allocation0 + $0x3f] ss:$-1 sm:$0xff]  ;;  %v157_v37 = vld [vmem:[#allocation0 + $0x4f] ss:$-1 sm:$0xff]  ;;  %v167_v38 = vrot.slane %v166_v27, 1 }
   0xe   :  { %v144_v36 = vrot.slane %v143_v34, 1  ;;  %v171_v39 = vld [vmem:[#allocation0 + $0x5f] ss:$-1 sm:$0xff]  ;;  %106 = vst.msk [vmem:[#allocation1] sm:$0xff] %vm105_vm0, %v102_v31  ;;  %120 = vst.msk [vmem:[#allocation1 + $0x8] sm:$0xff] %vm105_vm0, %v116_v32  ;;  %v158_v40 = vrot.slane %v157_v37, 1 }
   0xf   :  { %134 = vst.msk [vmem:[#allocation1 + $0x10] sm:$0xff] %vm105_vm0, %v130_v33  ;;  %154 = vst [vmem:[#allocation1 + $0x20] sm:$0xff] %v153_v35  ;;  %v172_v41 = vrot.slane %v171_v39, 1  ;;  %v180_v42 = vld [vmem:[#allocation0 + $0x67] ss:$-1 sm:$0xff] }
  0x10   :  { %v185_v43 = vld [vmem:[#allocation0 + $0x6f] ss:$-1 sm:$0xff]  ;;  %148 = vst.msk [vmem:[#allocation1 + $0x18] sm:$0xff] %vm105_vm0, %v144_v36  ;;  %168 = vst [vmem:[#allocation1 + $0x28] sm:$0xff] %v167_v38  ;;  %v181_v44 = vrot.slane %v180_v42, 1 }
  0x11   :  { %v186_v45 = vrot.slane %v185_v43, 1  ;;  %v194_v46 = vld [vmem:[#allocation0 + $0x77] ss:$-1 sm:$0xff]  ;;  %v199_v47 = vld [vmem:[#allocation0 + $0x7f] ss:$-1 sm:$0xff]  ;;  %162 = vst.msk [vmem:[#allocation1 + $0x20] sm:$0xff] %vm105_vm0, %v158_v40 }
  0x12   :  { %176 = vst.msk [vmem:[#allocation1 + $0x28] sm:$0xff] %vm105_vm0, %v172_v41  ;;  %v195_v48 = vrot.slane %v194_v46, 1  ;;  %v200_v49 = vrot.slane %v199_v47, 1  ;;  %v208_v50 = vld [vmem:[#allocation0 + $0x87] ss:$-1 sm:$0xff]  ;;  %182 = vst [vmem:[#allocation1 + $0x30] sm:$0xff] %v181_v44 }
  0x13   :  { %v213_v51 = vld [vmem:[#allocation0 + $0x8f] ss:$-1 sm:$0xff]  ;;  %v209_v52 = vrot.slane %v208_v50, 1  ;;  %v222_v54 = vld [vmem:[#allocation0 + $0x97] ss:$-1 sm:$0xff]  ;;  %190 = vst.msk [vmem:[#allocation1 + $0x30] sm:$0xff] %vm105_vm0, %v186_v45 }
  0x14   :  { %v214_v53 = vrot.slane %v213_v51, 1  ;;  %v227_v55 = vld [vmem:[#allocation0 + $0x9f] ss:$-1 sm:$0xff]  ;;  %196 = vst [vmem:[#allocation1 + $0x38] sm:$0xff] %v195_v48  ;;  %v223_v56 = vrot.slane %v222_v54, 1 }
  0x15   :  { %v228_v57 = vrot.slane %v227_v55, 1  ;;  %v236_v58 = vld [vmem:[#allocation0 + $0xa7] ss:$-1 sm:$0xff]  ;;  %v241_v59 = vld [vmem:[#allocation0 + $0xaf] ss:$-1 sm:$0xff]  ;;  %204 = vst.msk [vmem:[#allocation1 + $0x38] sm:$0xff] %vm105_vm0, %v200_v49 }
  0x16   :  { %210 = vst [vmem:[#allocation1 + $0x40] sm:$0xff] %v209_v52  ;;  %v237_v60 = vrot.slane %v236_v58, 1  ;;  %v242_v61 = vrot.slane %v241_v59, 1  ;;  %v250_v62 = vld [vmem:[#allocation0 + $0xb7] ss:$-1 sm:$0xff]  ;;  %224 = vst [vmem:[#allocation1 + $0x48] sm:$0xff] %v223_v56 }
  0x17   :  { %v255_v63 = vld [vmem:[#allocation0 + $0xbf] ss:$-1 sm:$0xff]  ;;  %218 = vst.msk [vmem:[#allocation1 + $0x40] sm:$0xff] %vm105_vm0, %v214_v53  ;;  %v251_v0 = vrot.slane %v250_v62, 1  ;;  %v264_v2 = vld [vmem:[#allocation0 + $0xc7] ss:$-1 sm:$0xff] }
  0x18   :  { %v256_v1 = vrot.slane %v255_v63, 1  ;;  %v269_v3 = vld [vmem:[#allocation0 + $0xcf] ss:$-1 sm:$0xff]  ;;  %232 = vst.msk [vmem:[#allocation1 + $0x48] sm:$0xff] %vm105_vm0, %v228_v57  ;;  %238 = vst [vmem:[#allocation1 + $0x50] sm:$0xff] %v237_v60  ;;  %v265_v4 = vrot.slane %v264_v2, 1 }
  0x19   :  { %v270_v5 = vrot.slane %v269_v3, 1  ;;  %v278_v6 = vld [vmem:[#allocation0 + $0xd7] ss:$-1 sm:$0xff]  ;;  %v283_v7 = vld [vmem:[#allocation0 + $0xdf] ss:$-1 sm:$0xff]  ;;  %246 = vst.msk [vmem:[#allocation1 + $0x50] sm:$0xff] %vm105_vm0, %v242_v61 }
  0x1a   :  { %252 = vst [vmem:[#allocation1 + $0x58] sm:$0xff] %v251_v0  ;;  %v279_v8 = vrot.slane %v278_v6, 1  ;;  %v284_v9 = vrot.slane %v283_v7, 1  ;;  %v292_v11 = vld [vmem:[#allocation0 + $0xe7] ss:$-1 sm:$0xff]  ;;  %266 = vst [vmem:[#allocation1 + $0x60] sm:$0xff] %v265_v4 }
  0x1b   :  { %v297_v12 = vld [vmem:[#allocation0 + $0xef] ss:$-1 sm:$0xff]  ;;  %260 = vst.msk [vmem:[#allocation1 + $0x58] sm:$0xff] %vm105_vm0, %v256_v1  ;;  %v293_v13 = vrot.slane %v292_v11, 1  ;;  %v306_v15 = vld [vmem:[#allocation0 + $0xf7] ss:$-1 sm:$0xff] }
  0x1c   :  { %v298_v14 = vrot.slane %v297_v12, 1  ;;  %v311_v16 = vld [vmem:[#allocation0 + $0xff] ss:$-1 sm:$0xff]  ;;  %274 = vst.msk [vmem:[#allocation1 + $0x60] sm:$0xff] %vm105_vm0, %v270_v5  ;;  %280 = vst [vmem:[#allocation1 + $0x68] sm:$0xff] %v279_v8  ;;  %v307_v17 = vrot.slane %v306_v15, 1 }
  0x1d   :  { %v312_v18 = vrot.slane %v311_v16, 1  ;;  %v374_v19 = vld [vmem:[#allocation1] sm:$0xff]  ;;  %v376_v20 = vld [vmem:[#allocation1 + $0x8] sm:$0xff]  ;;  %v378_v21 = vld [vmem:[#allocation1 + $0x10] sm:$0xff]  ;;  %288 = vst.msk [vmem:[#allocation1 + $0x68] sm:$0xff] %vm105_vm0, %v284_v9 }
  0x1e   :  { %294 = vst [vmem:[#allocation1 + $0x70] sm:$0xff] %v293_v13  ;;  %375 = vst [vmem:[%s605_s1] sm:$0xff] %v374_v19  ;;  %v380_v22 = vld [vmem:[#allocation1 + $0x18] sm:$0xff]  ;;  %v382_v23 = vld [vmem:[#allocation1 + $0x20] sm:$0xff] }
  0x1f   :  { %377 = vst [vmem:[%s605_s1 + $0x8] sm:$0xff] %v376_v20  ;;  %379 = vst [vmem:[%s605_s1 + $0x10] sm:$0xff] %v378_v21  ;;  %v384_v24 = vld [vmem:[#allocation1 + $0x28] sm:$0xff]  ;;  %v386_v25 = vld [vmem:[#allocation1 + $0x30] sm:$0xff] }
  0x20   :  { %302 = vst.msk [vmem:[#allocation1 + $0x70] sm:$0xff] %vm105_vm0, %v298_v14  ;;  %308 = vst [vmem:[#allocation1 + $0x78] sm:$0xff] %v307_v17  ;;  %v388_v26 = vld [vmem:[#allocation1 + $0x38] sm:$0xff]  ;;  %v390_v10 = vld [vmem:[#allocation1 + $0x40] sm:$0xff] }
  0x21   :  { %381 = vst [vmem:[%s605_s1 + $0x18] sm:$0xff] %v380_v22  ;;  %383 = vst [vmem:[%s605_s1 + $0x20] sm:$0xff] %v382_v23  ;;  %v392_v27 = vld [vmem:[#allocation1 + $0x48] sm:$0xff]  ;;  %v394_v28 = vld [vmem:[#allocation1 + $0x50] sm:$0xff] }
  0x22   :  { %385 = vst [vmem:[%s605_s1 + $0x28] sm:$0xff] %v384_v24  ;;  %316 = vst.msk [vmem:[#allocation1 + $0x78] sm:$0xff] %vm105_vm0, %v312_v18  ;;  %v396_v29 = vld [vmem:[#allocation1 + $0x58] sm:$0xff] }
  0x23   :  { %387 = vst [vmem:[%s605_s1 + $0x30] sm:$0xff] %v386_v25  ;;  %389 = vst [vmem:[%s605_s1 + $0x38] sm:$0xff] %v388_v26  ;;  %v398_v30 = vld [vmem:[#allocation1 + $0x60] sm:$0xff] }
  0x24   :  { %391 = vst [vmem:[%s605_s1 + $0x40] sm:$0xff] %v390_v10  ;;  %393 = vst [vmem:[%s605_s1 + $0x48] sm:$0xff] %v392_v27  ;;  %v400_v31 = vld [vmem:[#allocation1 + $0x68] sm:$0xff] }
  0x25   :  { %395 = vst [vmem:[%s605_s1 + $0x50] sm:$0xff] %v394_v28  ;;  %397 = vst [vmem:[%s605_s1 + $0x58] sm:$0xff] %v396_v29 }
  0x26   :  { %399 = vst [vmem:[%s605_s1 + $0x60] sm:$0xff] %v398_v30  ;;  %401 = vst [vmem:[%s605_s1 + $0x68] sm:$0xff] %v400_v31 }
  0x27   :  { %v402_v32 = vld [vmem:[#allocation1 + $0x70] sm:$0xff] }
  0x28   :  { %403 = vst [vmem:[%s605_s1 + $0x70] sm:$0xff] %v402_v32 }
  0x29   :  { %v404_v33 = vld [vmem:[#allocation1 + $0x78] sm:$0xff] }
  0x2a   :  { %405 = vst [vmem:[%s605_s1 + $0x78] sm:$0xff] %v404_v33 }

</bundles_post_ra>
